<compile_context>
chip_gen: v5e
topology: v5e:2x2
jax: 0.10.0
libtpu: 0.0.40
codegen_flags: <defaults>
</compile_context>

<pallas_src>
import numpy as np
import jax
import jax.numpy as jnp
from jax.experimental import pallas as pl
from jax.experimental.pallas import tpu as pltpu


NPAD = 128   # lane-dense output width (>= cfg.n)


# ----------------------------- config ---------------------------------------
class Config:
    n = 16                  # number of nodes
    fdim = 8                # input feature dim
    nhid1 = 16              # GRU hidden / out_dim
    head_num = 2            # attention heads
    walk_len = 4            # length of each sub-walk (path)
    long_walk_len = 6       # length of the long random walk
    long_walks_per_node = 2
    dropout = 0.0           # never applied in the reference forward either

    @property
    def walks_per_node(self):
        # = long_walks_per_node * num_walks_per_rw
        return self.long_walks_per_node * (1 + self.long_walk_len + 1 - self.walk_len)


# ----------------------------- fused Pallas kernel ---------------------------
def fused_kernel(x_ref, wih_ref, whh_ref, bih_ref, bhh_ref, a_ref, mt_ref, o_ref):
    """Both PathAgg layers (GRU + attention + aggregation + ReLU) in one body.

    Shapes (leading axis = layer):
      x_ref:   (2, F, L*P)    bf16  path features; column t*P + p = (step t, path p)
      wih_ref: (2, 3D, F)     bf16  GRU input weights  (gate order [r, z, n])
      whh_ref: (2, 3D, D)     bf16  GRU hidden weights (gate order [r, z, n])
      bih_ref: (2, 3D, 1)     f32
      bhh_ref: (2, 3D, 1)     f32
      a_ref:   (2, H, D)      bf16  attention vectors (transposed)
      mt_ref:  (2, P, NPAD)   bf16  M.T zero-padded to 128 lanes
      o_ref:   (2*H*D, NPAD)  f32   relu(node_att_emb).T, layer row-blocks stacked
    """
    num_layers, _F, LP = x_ref.shape
    D = whh_ref.shape[2]
    H = a_ref.shape[1]
    P = mt_ref.shape[1]
    L = LP // P
    HD = H * D

    for l in range(num_layers):                    # two independent chains in one
        wih = wih_ref[l]                           # basic block -> scheduler
        whh = whh_ref[l]                           # interleaves them

        # ---- hoisted GRU input projection: all L steps in one MXU push ------
        gi_all = jnp.dot(wih, x_ref[l],
                         preferred_element_type=jnp.float32) + bih_ref[l]     # (3D, L*P)
        bhh_b = jnp.broadcast_to(bhh_ref[l], (3 * D, P))                       # hoisted

        # ---- GRU recurrence, fully unrolled (PyTorch gate order [r, z, n]) --
        h = jnp.zeros((D, P), jnp.float32)
        for t in range(L):
            gi = gi_all[:, t * P:(t + 1) * P]                                  # (3D, P)
            if t == 0:
                gh = bhh_b                                                     # Whh @ 0 == 0
            else:
                gh = jnp.dot(whh, h.astype(jnp.bfloat16),
                             preferred_element_type=jnp.float32) + bhh_b
            r = jax.nn.sigmoid(gi[0:D] + gh[0:D])
            z = jax.nn.sigmoid(gi[D:2 * D] + gh[D:2 * D])
            n_ = jnp.tanh(gi[2 * D:3 * D] + r * gh[2 * D:3 * D])
            h = (1.0 - z) * n_ + z * h
        emb = h                                                                # (D, P)

        # ---- attention + fused normalization/aggregation --------------------
        a = a_ref[l]                                                           # (H, D)
        mt = mt_ref[l]                                                         # (P, NPAD)

        logits = jnp.dot(a, emb.astype(jnp.bfloat16),
                         preferred_element_type=jnp.float32)                   # (H, P)
        lrelu = jnp.where(logits > 0, logits, 0.2 * logits)                    # leaky_relu(0.2)
        att_un = jnp.exp(lrelu)                                                # (H, P) f32

        # per-node denominator (padded columns of mt are all-zero -> guarded floor;
        # real sums are >> 1e-30 so the floor is a no-op for valid nodes)
        s = jnp.dot(att_un.astype(jnp.bfloat16), mt,
                    preferred_element_type=jnp.float32)                        # (H, NPAD)
        inv = pl.reciprocal(jnp.maximum(s, 1e-30), approx=True)                # EUP slot

        # unnormalized per-head weighted path embeddings, aggregated to nodes,
        # then scaled by inv (normalization commutes with the linear M.T agg)
        pae = (att_un[:, None, :] * emb[None, :, :]).reshape(HD, P)            # (H*D, P)
        u = jnp.dot(pae.astype(jnp.bfloat16), mt,
                    preferred_element_type=jnp.float32)                        # (H*D, NPAD)
        out_l = (u.reshape(H, D, -1) * inv[:, None, :]).reshape(HD, -1)        # (H*D, NPAD)

        # fused final ReLU (commutes with the wrapper-side slice/transpose)
        o_ref[l * HD:(l + 1) * HD, :] = jnp.maximum(out_l, 0.0)


def fused_forward(x_all, wih_all, whh_all, bih_all, bhh_all, a_all, mt_all):
    """Returns (num_layers*H*D, NPAD) f32, ReLU already applied."""
    num_layers = x_all.shape[0]
    D = whh_all.shape[2]
    H = a_all.shape[1]
    npad = mt_all.shape[2]

    vmem = lambda: pl.BlockSpec(memory_space=pltpu.MemorySpace.VMEM)
    return pl.pallas_call(
        fused_kernel,
        out_shape=jax.ShapeDtypeStruct((num_layers * H * D, npad), jnp.float32),
        in_specs=[vmem() for _ in range(7)],
        out_specs=vmem(),
    )(x_all, wih_all, whh_all, bih_all, bhh_all, a_all, mt_all)


# ----------------------------- graph / walk glue (numpy) --------------------
def build_graph(n, rng):
    src = rng.integers(0, n, size=40)
    dst = rng.integers(0, n, size=40)
    return np.stack([src, dst], axis=0)


def load_graph_edgelist_no_loop(edge_index):
    edges = set()
    for s, d in edge_index.T:
        if s != d:
            edges.add((int(s), int(d)))
            edges.add((int(d), int(s)))      # to_undirected
    return np.array(sorted(edges), dtype=np.int64).T


def add_self_loop_for_all_nodes(edges, n):
    loops = np.stack([np.arange(n), np.arange(n)], axis=0)
    return np.concatenate([edges, loops], axis=1)


def generate_random_walk_np(edges, cfg, seed):
    # TODO(synk): torch_cluster.random_walk's node2vec p/q-biased transitions
    # (DFS p=10,q=0.1 / BFS p=0.1,q=10) are not reproduced; uniform neighbor
    # sampling with a per-strategy seed is used instead.
    n = cfg.n
    adj = [[] for _ in range(n)]
    for s, d in edges.T:
        adj[int(s)].append(int(d))
    rng = np.random.default_rng(seed)
    batch = np.tile(np.arange(n), cfg.long_walks_per_node)
    L = cfg.long_walk_len
    rw = np.zeros((len(batch), L + 1), dtype=np.int64)
    rw[:, 0] = batch
    for i in range(len(batch)):
        for t in range(L):
            nbrs = adj[rw[i, t]]
            rw[i, t + 1] = nbrs[rng.integers(0, len(nbrs))]
    num_walks_per_rw = 1 + L + 1 - cfg.walk_len
    walks = [rw[:, j:j + cfg.walk_len] for j in range(num_walks_per_rw)]
    out = np.concatenate(walks, axis=0)
    out = out[:, ::-1].copy()               # reverse along walk dim
    return out                               # (P, walk_len), P = walks_per_node * n


# ----------------------------- model ----------------------------------------
def init_layer_params(key, in_dim, out_dim, head_num):
    """PyTorch-shaped GRU params: Wih (3D,F), Whh (3D,D), bih/bhh (3D,), a (D,H)."""
    k = 1.0 / float(np.sqrt(out_dim))
    k1, k2, k3, k4, k5 = jax.random.split(key, 5)
    Wih = jax.random.uniform(k1, (3 * out_dim, in_dim), jnp.float32, -k, k)
    Whh = jax.random.uniform(k2, (3 * out_dim, out_dim), jnp.float32, -k, k)
    bih = jax.random.uniform(k3, (3 * out_dim,), jnp.float32, -k, k)
    bhh = jax.random.uniform(k4, (3 * out_dim,), jnp.float32, -k, k)
    a = jax.random.uniform(k5, (out_dim, head_num), jnp.float32) * 2.0 - 1.0
    return (Wih, Whh, bih, bhh, a)


def build_layer_inputs(features, walks, params, cfg):
    """Layout plumbing: (F, L*P) time-flattened features, padded M.T, bf16 MXU operands."""
    Wih, Whh, bih, bhh, a = params
    P, L = walks.shape
    F = Wih.shape[1]

    path_feats = features[walks].astype(jnp.float32)                 # (P, L, F)
    # (F, L, P) row-major -> column index t*P + p matches the in-kernel slices
    x_flat = jnp.transpose(path_feats, (2, 1, 0)).reshape(F, L * P)  # (F, L*P)

    last_nodes = walks[:, -1]
    Mt = (last_nodes[:, None] == jnp.arange(cfg.n)[None, :]).astype(jnp.float32)   # (P, n)
    Mt_pad = jnp.zeros((P, NPAD), jnp.float32).at[:, :cfg.n].set(Mt)               # lane-dense

    return (x_flat.astype(jnp.bfloat16),
            Wih.astype(jnp.bfloat16),
            Whh.astype(jnp.bfloat16),
            bih[:, None].astype(jnp.float32),
            bhh[:, None].astype(jnp.float32),
            a.T.astype(jnp.bfloat16),        # (H, D)
            Mt_pad.astype(jnp.bfloat16))


def model_forward(features, edge_index, params1, params2, cfg):
    edges = load_graph_edgelist_no_loop(edge_index)
    edges = add_self_loop_for_all_nodes(edges, cfg.n)
    walks_dfs = jnp.asarray(generate_random_walk_np(edges, cfg, seed=10))  # layer1 'DFS'
    walks_bfs = jnp.asarray(generate_random_walk_np(edges, cfg, seed=20))  # layer2 'BFS'

    in1 = build_layer_inputs(features, walks_dfs, params1, cfg)
    in2 = build_layer_inputs(features, walks_bfs, params2, cfg)
    stacked = [jnp.stack([p, q], axis=0) for p, q in zip(in1, in2)]

    out = fused_forward(*stacked)                  # (2*H*D, NPAD), ReLU applied
    # (2*H*D, NPAD) -> slice valid node columns, transpose:
    #   == relu(concat([x1, x2], axis=1)) with x_l of shape (n, H*D)
    x3 = out[:, :cfg.n].T
    return x3


# ----------------------------- main ------------------------------------------
if __name__ == "__main__":
    cfg = Config()
    key = jax.random.PRNGKey(0)
    kf, kl1, kl2 = jax.random.split(key, 3)

    features = jax.random.normal(kf, (cfg.n, cfg.fdim), jnp.float32)
    params1 = init_layer_params(kl1, cfg.fdim, cfg.nhid1, cfg.head_num)
    params2 = init_layer_params(kl2, cfg.fdim, cfg.nhid1, cfg.head_num)

    edge_index = build_graph(cfg.n, np.random.default_rng(0))

    out = model_forward(features, edge_index, params1, params2, cfg)
    out = jax.block_until_ready(out)

    assert out.shape == (cfg.n, 2 * cfg.head_num * cfg.nhid1), out.shape
    assert bool(jnp.all(jnp.isfinite(out)))
    assert bool(jnp.all(out >= 0.0))  # post-ReLU
    print("KERNEL_OK")
</pallas_src>

<mosaic_0001>
module attributes {stable_mosaic.version = 11 : i64} {
  func.func @fused_kernel(%arg0: memref<2x8x512xbf16, #tpu.memory_space<vmem>>, %arg1: memref<2x48x8xbf16, #tpu.memory_space<vmem>>, %arg2: memref<2x48x16xbf16, #tpu.memory_space<vmem>>, %arg3: memref<2x48x1xf32, #tpu.memory_space<vmem>>, %arg4: memref<2x48x1xf32, #tpu.memory_space<vmem>>, %arg5: memref<2x2x16xbf16, #tpu.memory_space<vmem>>, %arg6: memref<2x128x128xbf16, #tpu.memory_space<vmem>>, %arg7: memref<64x128xf32, #tpu.memory_space<vmem>>) attributes {dimension_semantics = [], scalar_prefetch = 0 : i64, scratch_operands = 0 : i64, tpu.core_type = #tpu.core_type<tc>} {
    %c0 = arith.constant 0 : index
    %c0_0 = arith.constant 0 : index
    %c0_1 = arith.constant 0 : index
    %0 = vector.load %arg1[%c0, %c0_0, %c0_1] : memref<2x48x8xbf16, #tpu.memory_space<vmem>>, vector<1x48x8xbf16>
    %1 = vector.shape_cast %0 : vector<1x48x8xbf16> to vector<48x8xbf16>
    %c0_2 = arith.constant 0 : index
    %c0_3 = arith.constant 0 : index
    %c0_4 = arith.constant 0 : index
    %2 = vector.load %arg2[%c0_2, %c0_3, %c0_4] : memref<2x48x16xbf16, #tpu.memory_space<vmem>>, vector<1x48x16xbf16>
    %3 = vector.shape_cast %2 : vector<1x48x16xbf16> to vector<48x16xbf16>
    %c0_5 = arith.constant 0 : index
    %c0_6 = arith.constant 0 : index
    %c0_7 = arith.constant 0 : index
    %4 = vector.load %arg0[%c0_5, %c0_6, %c0_7] : memref<2x8x512xbf16, #tpu.memory_space<vmem>>, vector<1x8x512xbf16>
    %5 = vector.shape_cast %4 : vector<1x8x512xbf16> to vector<8x512xbf16>
    %cst = arith.constant dense<0.000000e+00> : vector<48x512xf32>
    %6 = tpu.matmul %1, %5, %cst {dimension_numbers = #tpu.dot_dimension_numbers<[1], [0], [0], [1], [0, 0, 1, 1], [], []>} : vector<48x8xbf16>, vector<8x512xbf16>, vector<48x512xf32> -> vector<48x512xf32>
    %c0_8 = arith.constant 0 : index
    %c0_9 = arith.constant 0 : index
    %c0_10 = arith.constant 0 : index
    %7 = vector.load %arg3[%c0_8, %c0_9, %c0_10] : memref<2x48x1xf32, #tpu.memory_space<vmem>>, vector<1x48x1xf32>
    %8 = vector.shape_cast %7 : vector<1x48x1xf32> to vector<48x1xf32>
    %9 = vector.broadcast %8 : vector<48x1xf32> to vector<48x512xf32>
    %10 = arith.addf %6, %9 : vector<48x512xf32>
    %c0_11 = arith.constant 0 : index
    %c0_12 = arith.constant 0 : index
    %c0_13 = arith.constant 0 : index
    %11 = vector.load %arg4[%c0_11, %c0_12, %c0_13] : memref<2x48x1xf32, #tpu.memory_space<vmem>>, vector<1x48x1xf32>
    %12 = vector.shape_cast %11 : vector<1x48x1xf32> to vector<48x1xf32>
    %13 = vector.shape_cast %12 : vector<48x1xf32> to vector<48x1xf32>
    %14 = vector.broadcast %13 : vector<48x1xf32> to vector<48x128xf32>
    %cst_14 = arith.constant 0.000000e+00 : f32
    %15 = vector.broadcast %cst_14 : f32 to vector<16x128xf32>
    %16 = vector.extract_strided_slice %10 {offsets = [0, 0], sizes = [48, 128], strides = [1, 1]} : vector<48x512xf32> to vector<48x128xf32>
    %17 = vector.extract_strided_slice %16 {offsets = [0, 0], sizes = [16, 128], strides = [1, 1]} : vector<48x128xf32> to vector<16x128xf32>
    %18 = vector.extract_strided_slice %14 {offsets = [0, 0], sizes = [16, 128], strides = [1, 1]} : vector<48x128xf32> to vector<16x128xf32>
    %19 = arith.addf %17, %18 : vector<16x128xf32>
    %20 = arith.negf %19 : vector<16x128xf32>
    %21 = math.exp %20 : vector<16x128xf32>
    %cst_15 = arith.constant 1.000000e+00 : f32
    %22 = vector.broadcast %cst_15 : f32 to vector<16x128xf32>
    %23 = arith.addf %22, %21 : vector<16x128xf32>
    %24 = arith.divf %22, %23 : vector<16x128xf32>
    %25 = vector.extract_strided_slice %16 {offsets = [16, 0], sizes = [16, 128], strides = [1, 1]} : vector<48x128xf32> to vector<16x128xf32>
    %26 = vector.extract_strided_slice %14 {offsets = [16, 0], sizes = [16, 128], strides = [1, 1]} : vector<48x128xf32> to vector<16x128xf32>
    %27 = arith.addf %25, %26 : vector<16x128xf32>
    %28 = arith.negf %27 : vector<16x128xf32>
    %29 = math.exp %28 : vector<16x128xf32>
    %cst_16 = arith.constant 1.000000e+00 : f32
    %30 = vector.broadcast %cst_16 : f32 to vector<16x128xf32>
    %31 = arith.addf %30, %29 : vector<16x128xf32>
    %32 = arith.divf %30, %31 : vector<16x128xf32>
    %33 = vector.extract_strided_slice %16 {offsets = [32, 0], sizes = [16, 128], strides = [1, 1]} : vector<48x128xf32> to vector<16x128xf32>
    %34 = vector.extract_strided_slice %14 {offsets = [32, 0], sizes = [16, 128], strides = [1, 1]} : vector<48x128xf32> to vector<16x128xf32>
    %35 = arith.mulf %24, %34 : vector<16x128xf32>
    %36 = arith.addf %33, %35 : vector<16x128xf32>
    %37 = math.tanh %36 : vector<16x128xf32>
    %cst_17 = arith.constant 1.000000e+00 : f32
    %38 = vector.broadcast %cst_17 : f32 to vector<16x128xf32>
    %39 = arith.subf %38, %32 : vector<16x128xf32>
    %40 = arith.mulf %39, %37 : vector<16x128xf32>
    %41 = arith.mulf %32, %15 : vector<16x128xf32>
    %42 = arith.addf %40, %41 : vector<16x128xf32>
    %43 = vector.extract_strided_slice %10 {offsets = [0, 128], sizes = [48, 128], strides = [1, 1]} : vector<48x512xf32> to vector<48x128xf32>
    %44 = arith.truncf %42 : vector<16x128xf32> to vector<16x128xbf16>
    %cst_18 = arith.constant dense<0.000000e+00> : vector<48x128xf32>
    %45 = tpu.matmul %3, %44, %cst_18 {dimension_numbers = #tpu.dot_dimension_numbers<[1], [0], [0], [1], [0, 0, 1, 1], [], []>} : vector<48x16xbf16>, vector<16x128xbf16>, vector<48x128xf32> -> vector<48x128xf32>
    %46 = arith.addf %45, %14 : vector<48x128xf32>
    %47 = vector.extract_strided_slice %43 {offsets = [0, 0], sizes = [16, 128], strides = [1, 1]} : vector<48x128xf32> to vector<16x128xf32>
    %48 = vector.extract_strided_slice %46 {offsets = [0, 0], sizes = [16, 128], strides = [1, 1]} : vector<48x128xf32> to vector<16x128xf32>
    %49 = arith.addf %47, %48 : vector<16x128xf32>
    %50 = arith.negf %49 : vector<16x128xf32>
    %51 = math.exp %50 : vector<16x128xf32>
    %cst_19 = arith.constant 1.000000e+00 : f32
    %52 = vector.broadcast %cst_19 : f32 to vector<16x128xf32>
    %53 = arith.addf %52, %51 : vector<16x128xf32>
    %54 = arith.divf %52, %53 : vector<16x128xf32>
    %55 = vector.extract_strided_slice %43 {offsets = [16, 0], sizes = [16, 128], strides = [1, 1]} : vector<48x128xf32> to vector<16x128xf32>
    %56 = vector.extract_strided_slice %46 {offsets = [16, 0], sizes = [16, 128], strides = [1, 1]} : vector<48x128xf32> to vector<16x128xf32>
    %57 = arith.addf %55, %56 : vector<16x128xf32>
    %58 = arith.negf %57 : vector<16x128xf32>
    %59 = math.exp %58 : vector<16x128xf32>
    %cst_20 = arith.constant 1.000000e+00 : f32
    %60 = vector.broadcast %cst_20 : f32 to vector<16x128xf32>
    %61 = arith.addf %60, %59 : vector<16x128xf32>
    %62 = arith.divf %60, %61 : vector<16x128xf32>
    %63 = vector.extract_strided_slice %43 {offsets = [32, 0], sizes = [16, 128], strides = [1, 1]} : vector<48x128xf32> to vector<16x128xf32>
    %64 = vector.extract_strided_slice %46 {offsets = [32, 0], sizes = [16, 128], strides = [1, 1]} : vector<48x128xf32> to vector<16x128xf32>
    %65 = arith.mulf %54, %64 : vector<16x128xf32>
    %66 = arith.addf %63, %65 : vector<16x128xf32>
    %67 = math.tanh %66 : vector<16x128xf32>
    %cst_21 = arith.constant 1.000000e+00 : f32
    %68 = vector.broadcast %cst_21 : f32 to vector<16x128xf32>
    %69 = arith.subf %68, %62 : vector<16x128xf32>
    %70 = arith.mulf %69, %67 : vector<16x128xf32>
    %71 = arith.mulf %62, %42 : vector<16x128xf32>
    %72 = arith.addf %70, %71 : vector<16x128xf32>
    %73 = vector.extract_strided_slice %10 {offsets = [0, 256], sizes = [48, 128], strides = [1, 1]} : vector<48x512xf32> to vector<48x128xf32>
    %74 = arith.truncf %72 : vector<16x128xf32> to vector<16x128xbf16>
    %cst_22 = arith.constant dense<0.000000e+00> : vector<48x128xf32>
    %75 = tpu.matmul %3, %74, %cst_22 {dimension_numbers = #tpu.dot_dimension_numbers<[1], [0], [0], [1], [0, 0, 1, 1], [], []>} : vector<48x16xbf16>, vector<16x128xbf16>, vector<48x128xf32> -> vector<48x128xf32>
    %76 = arith.addf %75, %14 : vector<48x128xf32>
    %77 = vector.extract_strided_slice %73 {offsets = [0, 0], sizes = [16, 128], strides = [1, 1]} : vector<48x128xf32> to vector<16x128xf32>
    %78 = vector.extract_strided_slice %76 {offsets = [0, 0], sizes = [16, 128], strides = [1, 1]} : vector<48x128xf32> to vector<16x128xf32>
    %79 = arith.addf %77, %78 : vector<16x128xf32>
    %80 = arith.negf %79 : vector<16x128xf32>
    %81 = math.exp %80 : vector<16x128xf32>
    %cst_23 = arith.constant 1.000000e+00 : f32
    %82 = vector.broadcast %cst_23 : f32 to vector<16x128xf32>
    %83 = arith.addf %82, %81 : vector<16x128xf32>
    %84 = arith.divf %82, %83 : vector<16x128xf32>
    %85 = vector.extract_strided_slice %73 {offsets = [16, 0], sizes = [16, 128], strides = [1, 1]} : vector<48x128xf32> to vector<16x128xf32>
    %86 = vector.extract_strided_slice %76 {offsets = [16, 0], sizes = [16, 128], strides = [1, 1]} : vector<48x128xf32> to vector<16x128xf32>
    %87 = arith.addf %85, %86 : vector<16x128xf32>
    %88 = arith.negf %87 : vector<16x128xf32>
    %89 = math.exp %88 : vector<16x128xf32>
    %cst_24 = arith.constant 1.000000e+00 : f32
    %90 = vector.broadcast %cst_24 : f32 to vector<16x128xf32>
    %91 = arith.addf %90, %89 : vector<16x128xf32>
    %92 = arith.divf %90, %91 : vector<16x128xf32>
    %93 = vector.extract_strided_slice %73 {offsets = [32, 0], sizes = [16, 128], strides = [1, 1]} : vector<48x128xf32> to vector<16x128xf32>
    %94 = vector.extract_strided_slice %76 {offsets = [32, 0], sizes = [16, 128], strides = [1, 1]} : vector<48x128xf32> to vector<16x128xf32>
    %95 = arith.mulf %84, %94 : vector<16x128xf32>
    %96 = arith.addf %93, %95 : vector<16x128xf32>
    %97 = math.tanh %96 : vector<16x128xf32>
    %cst_25 = arith.constant 1.000000e+00 : f32
    %98 = vector.broadcast %cst_25 : f32 to vector<16x128xf32>
    %99 = arith.subf %98, %92 : vector<16x128xf32>
    %100 = arith.mulf %99, %97 : vector<16x128xf32>
    %101 = arith.mulf %92, %72 : vector<16x128xf32>
    %102 = arith.addf %100, %101 : vector<16x128xf32>
    %103 = vector.extract_strided_slice %10 {offsets = [0, 384], sizes = [48, 128], strides = [1, 1]} : vector<48x512xf32> to vector<48x128xf32>
    %104 = arith.truncf %102 : vector<16x128xf32> to vector<16x128xbf16>
    %cst_26 = arith.constant dense<0.000000e+00> : vector<48x128xf32>
    %105 = tpu.matmul %3, %104, %cst_26 {dimension_numbers = #tpu.dot_dimension_numbers<[1], [0], [0], [1], [0, 0, 1, 1], [], []>} : vector<48x16xbf16>, vector<16x128xbf16>, vector<48x128xf32> -> vector<48x128xf32>
    %106 = arith.addf %105, %14 : vector<48x128xf32>
    %107 = vector.extract_strided_slice %103 {offsets = [0, 0], sizes = [16, 128], strides = [1, 1]} : vector<48x128xf32> to vector<16x128xf32>
    %108 = vector.extract_strided_slice %106 {offsets = [0, 0], sizes = [16, 128], strides = [1, 1]} : vector<48x128xf32> to vector<16x128xf32>
    %109 = arith.addf %107, %108 : vector<16x128xf32>
    %110 = arith.negf %109 : vector<16x128xf32>
    %111 = math.exp %110 : vector<16x128xf32>
    %cst_27 = arith.constant 1.000000e+00 : f32
    %112 = vector.broadcast %cst_27 : f32 to vector<16x128xf32>
    %113 = arith.addf %112, %111 : vector<16x128xf32>
    %114 = arith.divf %112, %113 : vector<16x128xf32>
    %115 = vector.extract_strided_slice %103 {offsets = [16, 0], sizes = [16, 128], strides = [1, 1]} : vector<48x128xf32> to vector<16x128xf32>
    %116 = vector.extract_strided_slice %106 {offsets = [16, 0], sizes = [16, 128], strides = [1, 1]} : vector<48x128xf32> to vector<16x128xf32>
    %117 = arith.addf %115, %116 : vector<16x128xf32>
    %118 = arith.negf %117 : vector<16x128xf32>
    %119 = math.exp %118 : vector<16x128xf32>
    %cst_28 = arith.constant 1.000000e+00 : f32
    %120 = vector.broadcast %cst_28 : f32 to vector<16x128xf32>
    %121 = arith.addf %120, %119 : vector<16x128xf32>
    %122 = arith.divf %120, %121 : vector<16x128xf32>
    %123 = vector.extract_strided_slice %103 {offsets = [32, 0], sizes = [16, 128], strides = [1, 1]} : vector<48x128xf32> to vector<16x128xf32>
    %124 = vector.extract_strided_slice %106 {offsets = [32, 0], sizes = [16, 128], strides = [1, 1]} : vector<48x128xf32> to vector<16x128xf32>
    %125 = arith.mulf %114, %124 : vector<16x128xf32>
    %126 = arith.addf %123, %125 : vector<16x128xf32>
    %127 = math.tanh %126 : vector<16x128xf32>
    %cst_29 = arith.constant 1.000000e+00 : f32
    %128 = vector.broadcast %cst_29 : f32 to vector<16x128xf32>
    %129 = arith.subf %128, %122 : vector<16x128xf32>
    %130 = arith.mulf %129, %127 : vector<16x128xf32>
    %131 = arith.mulf %122, %102 : vector<16x128xf32>
    %132 = arith.addf %130, %131 : vector<16x128xf32>
    %c0_30 = arith.constant 0 : index
    %c0_31 = arith.constant 0 : index
    %c0_32 = arith.constant 0 : index
    %133 = vector.load %arg5[%c0_30, %c0_31, %c0_32] : memref<2x2x16xbf16, #tpu.memory_space<vmem>>, vector<1x2x16xbf16>
    %134 = vector.shape_cast %133 : vector<1x2x16xbf16> to vector<2x16xbf16>
    %c0_33 = arith.constant 0 : index
    %c0_34 = arith.constant 0 : index
    %c0_35 = arith.constant 0 : index
    %135 = vector.load %arg6[%c0_33, %c0_34, %c0_35] : memref<2x128x128xbf16, #tpu.memory_space<vmem>>, vector<1x128x128xbf16>
    %136 = vector.shape_cast %135 : vector<1x128x128xbf16> to vector<128x128xbf16>
    %137 = arith.truncf %132 : vector<16x128xf32> to vector<16x128xbf16>
    %cst_36 = arith.constant dense<0.000000e+00> : vector<2x128xf32>
    %138 = tpu.matmul %134, %137, %cst_36 {dimension_numbers = #tpu.dot_dimension_numbers<[1], [0], [0], [1], [0, 0, 1, 1], [], []>} : vector<2x16xbf16>, vector<16x128xbf16>, vector<2x128xf32> -> vector<2x128xf32>
    %cst_37 = arith.constant 0.000000e+00 : f32
    %139 = vector.broadcast %cst_37 : f32 to vector<2x128xf32>
    %140 = arith.cmpf ogt, %138, %139 : vector<2x128xf32>
    %cst_38 = arith.constant 2.000000e-01 : f32
    %141 = vector.broadcast %cst_38 : f32 to vector<2x128xf32>
    %142 = arith.mulf %141, %138 : vector<2x128xf32>
    %143 = arith.select %140, %138, %142 : vector<2x128xi1>, vector<2x128xf32>
    %144 = math.exp %143 : vector<2x128xf32>
    %145 = arith.truncf %144 : vector<2x128xf32> to vector<2x128xbf16>
    %cst_39 = arith.constant dense<0.000000e+00> : vector<2x128xf32>
    %146 = tpu.matmul %145, %136, %cst_39 {dimension_numbers = #tpu.dot_dimension_numbers<[1], [0], [0], [1], [0, 0, 1, 1], [], []>} : vector<2x128xbf16>, vector<128x128xbf16>, vector<2x128xf32> -> vector<2x128xf32>
    %cst_40 = arith.constant 1.000000e-30 : f32
    %147 = vector.broadcast %cst_40 : f32 to vector<2x128xf32>
    %148 = arith.maximumf %146, %147 : vector<2x128xf32>
    %149 = tpu.reciprocal %148 {approx = true} : vector<2x128xf32> -> vector<2x128xf32>
    %150 = vector.shape_cast %144 : vector<2x128xf32> to vector<2x1x128xf32>
    %151 = vector.shape_cast %132 : vector<16x128xf32> to vector<1x16x128xf32>
    %152 = vector.broadcast %150 : vector<2x1x128xf32> to vector<2x16x128xf32>
    %153 = vector.broadcast %151 : vector<1x16x128xf32> to vector<2x16x128xf32>
    %154 = arith.mulf %152, %153 : vector<2x16x128xf32>
    %155 = vector.shape_cast %154 : vector<2x16x128xf32> to vector<32x128xf32>
    %156 = arith.truncf %155 : vector<32x128xf32> to vector<32x128xbf16>
    %cst_41 = arith.constant dense<0.000000e+00> : vector<32x128xf32>
    %157 = tpu.matmul %156, %136, %cst_41 {dimension_numbers = #tpu.dot_dimension_numbers<[1], [0], [0], [1], [0, 0, 1, 1], [], []>} : vector<32x128xbf16>, vector<128x128xbf16>, vector<32x128xf32> -> vector<32x128xf32>
    %158 = vector.shape_cast %157 : vector<32x128xf32> to vector<2x16x128xf32>
    %159 = vector.shape_cast %149 : vector<2x128xf32> to vector<2x1x128xf32>
    %160 = vector.broadcast %159 : vector<2x1x128xf32> to vector<2x16x128xf32>
    %161 = arith.mulf %158, %160 : vector<2x16x128xf32>
    %162 = vector.shape_cast %161 : vector<2x16x128xf32> to vector<32x128xf32>
    %cst_42 = arith.constant 0.000000e+00 : f32
    %163 = vector.broadcast %cst_42 : f32 to vector<32x128xf32>
    %164 = arith.maximumf %162, %163 : vector<32x128xf32>
    %c0_43 = arith.constant 0 : index
    %c0_44 = arith.constant 0 : index
    %165 = vector.load %arg7[%c0_43, %c0_44] : memref<64x128xf32, #tpu.memory_space<vmem>>, vector<32x128xf32>
    tpu.vector_store %arg7[%c0_43, %c0_44], %164 {strides = array<i32>} : memref<64x128xf32, #tpu.memory_space<vmem>>, vector<32x128xf32>,
    %c1 = arith.constant 1 : index
    %c0_45 = arith.constant 0 : index
    %c0_46 = arith.constant 0 : index
    %166 = vector.load %arg1[%c1, %c0_45, %c0_46] : memref<2x48x8xbf16, #tpu.memory_space<vmem>>, vector<1x48x8xbf16>
    %167 = vector.shape_cast %166 : vector<1x48x8xbf16> to vector<48x8xbf16>
    %c1_47 = arith.constant 1 : index
    %c0_48 = arith.constant 0 : index
    %c0_49 = arith.constant 0 : index
    %168 = vector.load %arg2[%c1_47, %c0_48, %c0_49] : memref<2x48x16xbf16, #tpu.memory_space<vmem>>, vector<1x48x16xbf16>
    %169 = vector.shape_cast %168 : vector<1x48x16xbf16> to vector<48x16xbf16>
    %c1_50 = arith.constant 1 : index
    %c0_51 = arith.constant 0 : index
    %c0_52 = arith.constant 0 : index
    %170 = vector.load %arg0[%c1_50, %c0_51, %c0_52] : memref<2x8x512xbf16, #tpu.memory_space<vmem>>, vector<1x8x512xbf16>
    %171 = vector.shape_cast %170 : vector<1x8x512xbf16> to vector<8x512xbf16>
    %cst_53 = arith.constant dense<0.000000e+00> : vector<48x512xf32>
    %172 = tpu.matmul %167, %171, %cst_53 {dimension_numbers = #tpu.dot_dimension_numbers<[1], [0], [0], [1], [0, 0, 1, 1], [], []>} : vector<48x8xbf16>, vector<8x512xbf16>, vector<48x512xf32> -> vector<48x512xf32>
    %c1_54 = arith.constant 1 : index
    %c0_55 = arith.constant 0 : index
    %c0_56 = arith.constant 0 : index
    %173 = vector.load %arg3[%c1_54, %c0_55, %c0_56] : memref<2x48x1xf32, #tpu.memory_space<vmem>>, vector<1x48x1xf32>
    %174 = vector.shape_cast %173 : vector<1x48x1xf32> to vector<48x1xf32>
    %175 = vector.broadcast %174 : vector<48x1xf32> to vector<48x512xf32>
    %176 = arith.addf %172, %175 : vector<48x512xf32>
    %c1_57 = arith.constant 1 : index
    %c0_58 = arith.constant 0 : index
    %c0_59 = arith.constant 0 : index
    %177 = vector.load %arg4[%c1_57, %c0_58, %c0_59] : memref<2x48x1xf32, #tpu.memory_space<vmem>>, vector<1x48x1xf32>
    %178 = vector.shape_cast %177 : vector<1x48x1xf32> to vector<48x1xf32>
    %179 = vector.shape_cast %178 : vector<48x1xf32> to vector<48x1xf32>
    %180 = vector.broadcast %179 : vector<48x1xf32> to vector<48x128xf32>
    %cst_60 = arith.constant 0.000000e+00 : f32
    %181 = vector.broadcast %cst_60 : f32 to vector<16x128xf32>
    %182 = vector.extract_strided_slice %176 {offsets = [0, 0], sizes = [48, 128], strides = [1, 1]} : vector<48x512xf32> to vector<48x128xf32>
    %183 = vector.extract_strided_slice %182 {offsets = [0, 0], sizes = [16, 128], strides = [1, 1]} : vector<48x128xf32> to vector<16x128xf32>
    %184 = vector.extract_strided_slice %180 {offsets = [0, 0], sizes = [16, 128], strides = [1, 1]} : vector<48x128xf32> to vector<16x128xf32>
    %185 = arith.addf %183, %184 : vector<16x128xf32>
    %186 = arith.negf %185 : vector<16x128xf32>
    %187 = math.exp %186 : vector<16x128xf32>
    %cst_61 = arith.constant 1.000000e+00 : f32
    %188 = vector.broadcast %cst_61 : f32 to vector<16x128xf32>
    %189 = arith.addf %188, %187 : vector<16x128xf32>
    %190 = arith.divf %188, %189 : vector<16x128xf32>
    %191 = vector.extract_strided_slice %182 {offsets = [16, 0], sizes = [16, 128], strides = [1, 1]} : vector<48x128xf32> to vector<16x128xf32>
    %192 = vector.extract_strided_slice %180 {offsets = [16, 0], sizes = [16, 128], strides = [1, 1]} : vector<48x128xf32> to vector<16x128xf32>
    %193 = arith.addf %191, %192 : vector<16x128xf32>
    %194 = arith.negf %193 : vector<16x128xf32>
    %195 = math.exp %194 : vector<16x128xf32>
    %cst_62 = arith.constant 1.000000e+00 : f32
    %196 = vector.broadcast %cst_62 : f32 to vector<16x128xf32>
    %197 = arith.addf %196, %195 : vector<16x128xf32>
    %198 = arith.divf %196, %197 : vector<16x128xf32>
    %199 = vector.extract_strided_slice %182 {offsets = [32, 0], sizes = [16, 128], strides = [1, 1]} : vector<48x128xf32> to vector<16x128xf32>
    %200 = vector.extract_strided_slice %180 {offsets = [32, 0], sizes = [16, 128], strides = [1, 1]} : vector<48x128xf32> to vector<16x128xf32>
    %201 = arith.mulf %190, %200 : vector<16x128xf32>
    %202 = arith.addf %199, %201 : vector<16x128xf32>
    %203 = math.tanh %202 : vector<16x128xf32>
    %cst_63 = arith.constant 1.000000e+00 : f32
    %204 = vector.broadcast %cst_63 : f32 to vector<16x128xf32>
    %205 = arith.subf %204, %198 : vector<16x128xf32>
    %206 = arith.mulf %205, %203 : vector<16x128xf32>
    %207 = arith.mulf %198, %181 : vector<16x128xf32>
    %208 = arith.addf %206, %207 : vector<16x128xf32>
    %209 = vector.extract_strided_slice %176 {offsets = [0, 128], sizes = [48, 128], strides = [1, 1]} : vector<48x512xf32> to vector<48x128xf32>
    %210 = arith.truncf %208 : vector<16x128xf32> to vector<16x128xbf16>
    %cst_64 = arith.constant dense<0.000000e+00> : vector<48x128xf32>
    %211 = tpu.matmul %169, %210, %cst_64 {dimension_numbers = #tpu.dot_dimension_numbers<[1], [0], [0], [1], [0, 0, 1, 1], [], []>} : vector<48x16xbf16>, vector<16x128xbf16>, vector<48x128xf32> -> vector<48x128xf32>
    %212 = arith.addf %211, %180 : vector<48x128xf32>
    %213 = vector.extract_strided_slice %209 {offsets = [0, 0], sizes = [16, 128], strides = [1, 1]} : vector<48x128xf32> to vector<16x128xf32>
    %214 = vector.extract_strided_slice %212 {offsets = [0, 0], sizes = [16, 128], strides = [1, 1]} : vector<48x128xf32> to vector<16x128xf32>
    %215 = arith.addf %213, %214 : vector<16x128xf32>
    %216 = arith.negf %215 : vector<16x128xf32>
    %217 = math.exp %216 : vector<16x128xf32>
    %cst_65 = arith.constant 1.000000e+00 : f32
    %218 = vector.broadcast %cst_65 : f32 to vector<16x128xf32>
    %219 = arith.addf %218, %217 : vector<16x128xf32>
    %220 = arith.divf %218, %219 : vector<16x128xf32>
    %221 = vector.extract_strided_slice %209 {offsets = [16, 0], sizes = [16, 128], strides = [1, 1]} : vector<48x128xf32> to vector<16x128xf32>
    %222 = vector.extract_strided_slice %212 {offsets = [16, 0], sizes = [16, 128], strides = [1, 1]} : vector<48x128xf32> to vector<16x128xf32>
    %223 = arith.addf %221, %222 : vector<16x128xf32>
    %224 = arith.negf %223 : vector<16x128xf32>
    %225 = math.exp %224 : vector<16x128xf32>
    %cst_66 = arith.constant 1.000000e+00 : f32
    %226 = vector.broadcast %cst_66 : f32 to vector<16x128xf32>
    %227 = arith.addf %226, %225 : vector<16x128xf32>
    %228 = arith.divf %226, %227 : vector<16x128xf32>
    %229 = vector.extract_strided_slice %209 {offsets = [32, 0], sizes = [16, 128], strides = [1, 1]} : vector<48x128xf32> to vector<16x128xf32>
    %230 = vector.extract_strided_slice %212 {offsets = [32, 0], sizes = [16, 128], strides = [1, 1]} : vector<48x128xf32> to vector<16x128xf32>
    %231 = arith.mulf %220, %230 : vector<16x128xf32>
    %232 = arith.addf %229, %231 : vector<16x128xf32>
    %233 = math.tanh %232 : vector<16x128xf32>
    %cst_67 = arith.constant 1.000000e+00 : f32
    %234 = vector.broadcast %cst_67 : f32 to vector<16x128xf32>
    %235 = arith.subf %234, %228 : vector<16x128xf32>
    %236 = arith.mulf %235, %233 : vector<16x128xf32>
    %237 = arith.mulf %228, %208 : vector<16x128xf32>
    %238 = arith.addf %236, %237 : vector<16x128xf32>
    %239 = vector.extract_strided_slice %176 {offsets = [0, 256], sizes = [48, 128], strides = [1, 1]} : vector<48x512xf32> to vector<48x128xf32>
    %240 = arith.truncf %238 : vector<16x128xf32> to vector<16x128xbf16>
    %cst_68 = arith.constant dense<0.000000e+00> : vector<48x128xf32>
    %241 = tpu.matmul %169, %240, %cst_68 {dimension_numbers = #tpu.dot_dimension_numbers<[1], [0], [0], [1], [0, 0, 1, 1], [], []>} : vector<48x16xbf16>, vector<16x128xbf16>, vector<48x128xf32> -> vector<48x128xf32>
    %242 = arith.addf %241, %180 : vector<48x128xf32>
    %243 = vector.extract_strided_slice %239 {offsets = [0, 0], sizes = [16, 128], strides = [1, 1]} : vector<48x128xf32> to vector<16x128xf32>
    %244 = vector.extract_strided_slice %242 {offsets = [0, 0], sizes = [16, 128], strides = [1, 1]} : vector<48x128xf32> to vector<16x128xf32>
    %245 = arith.addf %243, %244 : vector<16x128xf32>
    %246 = arith.negf %245 : vector<16x128xf32>
    %247 = math.exp %246 : vector<16x128xf32>
    %cst_69 = arith.constant 1.000000e+00 : f32
    %248 = vector.broadcast %cst_69 : f32 to vector<16x128xf32>
    %249 = arith.addf %248, %247 : vector<16x128xf32>
    %250 = arith.divf %248, %249 : vector<16x128xf32>
    %251 = vector.extract_strided_slice %239 {offsets = [16, 0], sizes = [16, 128], strides = [1, 1]} : vector<48x128xf32> to vector<16x128xf32>
    %252 = vector.extract_strided_slice %242 {offsets = [16, 0], sizes = [16, 128], strides = [1, 1]} : vector<48x128xf32> to vector<16x128xf32>
    %253 = arith.addf %251, %252 : vector<16x128xf32>
    %254 = arith.negf %253 : vector<16x128xf32>
    %255 = math.exp %254 : vector<16x128xf32>
    %cst_70 = arith.constant 1.000000e+00 : f32
    %256 = vector.broadcast %cst_70 : f32 to vector<16x128xf32>
    %257 = arith.addf %256, %255 : vector<16x128xf32>
    %258 = arith.divf %256, %257 : vector<16x128xf32>
    %259 = vector.extract_strided_slice %239 {offsets = [32, 0], sizes = [16, 128], strides = [1, 1]} : vector<48x128xf32> to vector<16x128xf32>
    %260 = vector.extract_strided_slice %242 {offsets = [32, 0], sizes = [16, 128], strides = [1, 1]} : vector<48x128xf32> to vector<16x128xf32>
    %261 = arith.mulf %250, %260 : vector<16x128xf32>
    %262 = arith.addf %259, %261 : vector<16x128xf32>
    %263 = math.tanh %262 : vector<16x128xf32>
    %cst_71 = arith.constant 1.000000e+00 : f32
    %264 = vector.broadcast %cst_71 : f32 to vector<16x128xf32>
    %265 = arith.subf %264, %258 : vector<16x128xf32>
    %266 = arith.mulf %265, %263 : vector<16x128xf32>
    %267 = arith.mulf %258, %238 : vector<16x128xf32>
    %268 = arith.addf %266, %267 : vector<16x128xf32>
    %269 = vector.extract_strided_slice %176 {offsets = [0, 384], sizes = [48, 128], strides = [1, 1]} : vector<48x512xf32> to vector<48x128xf32>
    %270 = arith.truncf %268 : vector<16x128xf32> to vector<16x128xbf16>
    %cst_72 = arith.constant dense<0.000000e+00> : vector<48x128xf32>
    %271 = tpu.matmul %169, %270, %cst_72 {dimension_numbers = #tpu.dot_dimension_numbers<[1], [0], [0], [1], [0, 0, 1, 1], [], []>} : vector<48x16xbf16>, vector<16x128xbf16>, vector<48x128xf32> -> vector<48x128xf32>
    %272 = arith.addf %271, %180 : vector<48x128xf32>
    %273 = vector.extract_strided_slice %269 {offsets = [0, 0], sizes = [16, 128], strides = [1, 1]} : vector<48x128xf32> to vector<16x128xf32>
    %274 = vector.extract_strided_slice %272 {offsets = [0, 0], sizes = [16, 128], strides = [1, 1]} : vector<48x128xf32> to vector<16x128xf32>
    %275 = arith.addf %273, %274 : vector<16x128xf32>
    %276 = arith.negf %275 : vector<16x128xf32>
    %277 = math.exp %276 : vector<16x128xf32>
    %cst_73 = arith.constant 1.000000e+00 : f32
    %278 = vector.broadcast %cst_73 : f32 to vector<16x128xf32>
    %279 = arith.addf %278, %277 : vector<16x128xf32>
    %280 = arith.divf %278, %279 : vector<16x128xf32>
    %281 = vector.extract_strided_slice %269 {offsets = [16, 0], sizes = [16, 128], strides = [1, 1]} : vector<48x128xf32> to vector<16x128xf32>
    %282 = vector.extract_strided_slice %272 {offsets = [16, 0], sizes = [16, 128], strides = [1, 1]} : vector<48x128xf32> to vector<16x128xf32>
    %283 = arith.addf %281, %282 : vector<16x128xf32>
    %284 = arith.negf %283 : vector<16x128xf32>
    %285 = math.exp %284 : vector<16x128xf32>
    %cst_74 = arith.constant 1.000000e+00 : f32
    %286 = vector.broadcast %cst_74 : f32 to vector<16x128xf32>
    %287 = arith.addf %286, %285 : vector<16x128xf32>
    %288 = arith.divf %286, %287 : vector<16x128xf32>
    %289 = vector.extract_strided_slice %269 {offsets = [32, 0], sizes = [16, 128], strides = [1, 1]} : vector<48x128xf32> to vector<16x128xf32>
    %290 = vector.extract_strided_slice %272 {offsets = [32, 0], sizes = [16, 128], strides = [1, 1]} : vector<48x128xf32> to vector<16x128xf32>
    %291 = arith.mulf %280, %290 : vector<16x128xf32>
    %292 = arith.addf %289, %291 : vector<16x128xf32>
    %293 = math.tanh %292 : vector<16x128xf32>
    %cst_75 = arith.constant 1.000000e+00 : f32
    %294 = vector.broadcast %cst_75 : f32 to vector<16x128xf32>
    %295 = arith.subf %294, %288 : vector<16x128xf32>
    %296 = arith.mulf %295, %293 : vector<16x128xf32>
    %297 = arith.mulf %288, %268 : vector<16x128xf32>
    %298 = arith.addf %296, %297 : vector<16x128xf32>
    %c1_76 = arith.constant 1 : index
    %c0_77 = arith.constant 0 : index
    %c0_78 = arith.constant 0 : index
    %299 = vector.load %arg5[%c1_76, %c0_77, %c0_78] : memref<2x2x16xbf16, #tpu.memory_space<vmem>>, vector<1x2x16xbf16>
    %300 = vector.shape_cast %299 : vector<1x2x16xbf16> to vector<2x16xbf16>
    %c1_79 = arith.constant 1 : index
    %c0_80 = arith.constant 0 : index
    %c0_81 = arith.constant 0 : index
    %301 = vector.load %arg6[%c1_79, %c0_80, %c0_81] : memref<2x128x128xbf16, #tpu.memory_space<vmem>>, vector<1x128x128xbf16>
    %302 = vector.shape_cast %301 : vector<1x128x128xbf16> to vector<128x128xbf16>
    %303 = arith.truncf %298 : vector<16x128xf32> to vector<16x128xbf16>
    %cst_82 = arith.constant dense<0.000000e+00> : vector<2x128xf32>
    %304 = tpu.matmul %300, %303, %cst_82 {dimension_numbers = #tpu.dot_dimension_numbers<[1], [0], [0], [1], [0, 0, 1, 1], [], []>} : vector<2x16xbf16>, vector<16x128xbf16>, vector<2x128xf32> -> vector<2x128xf32>
    %cst_83 = arith.constant 0.000000e+00 : f32
    %305 = vector.broadcast %cst_83 : f32 to vector<2x128xf32>
    %306 = arith.cmpf ogt, %304, %305 : vector<2x128xf32>
    %cst_84 = arith.constant 2.000000e-01 : f32
    %307 = vector.broadcast %cst_84 : f32 to vector<2x128xf32>
    %308 = arith.mulf %307, %304 : vector<2x128xf32>
    %309 = arith.select %306, %304, %308 : vector<2x128xi1>, vector<2x128xf32>
    %310 = math.exp %309 : vector<2x128xf32>
    %311 = arith.truncf %310 : vector<2x128xf32> to vector<2x128xbf16>
    %cst_85 = arith.constant dense<0.000000e+00> : vector<2x128xf32>
    %312 = tpu.matmul %311, %302, %cst_85 {dimension_numbers = #tpu.dot_dimension_numbers<[1], [0], [0], [1], [0, 0, 1, 1], [], []>} : vector<2x128xbf16>, vector<128x128xbf16>, vector<2x128xf32> -> vector<2x128xf32>
    %cst_86 = arith.constant 1.000000e-30 : f32
    %313 = vector.broadcast %cst_86 : f32 to vector<2x128xf32>
    %314 = arith.maximumf %312, %313 : vector<2x128xf32>
    %315 = tpu.reciprocal %314 {approx = true} : vector<2x128xf32> -> vector<2x128xf32>
    %316 = vector.shape_cast %310 : vector<2x128xf32> to vector<2x1x128xf32>
    %317 = vector.shape_cast %298 : vector<16x128xf32> to vector<1x16x128xf32>
    %318 = vector.broadcast %316 : vector<2x1x128xf32> to vector<2x16x128xf32>
    %319 = vector.broadcast %317 : vector<1x16x128xf32> to vector<2x16x128xf32>
    %320 = arith.mulf %318, %319 : vector<2x16x128xf32>
    %321 = vector.shape_cast %320 : vector<2x16x128xf32> to vector<32x128xf32>
    %322 = arith.truncf %321 : vector<32x128xf32> to vector<32x128xbf16>
    %cst_87 = arith.constant dense<0.000000e+00> : vector<32x128xf32>
    %323 = tpu.matmul %322, %302, %cst_87 {dimension_numbers = #tpu.dot_dimension_numbers<[1], [0], [0], [1], [0, 0, 1, 1], [], []>} : vector<32x128xbf16>, vector<128x128xbf16>, vector<32x128xf32> -> vector<32x128xf32>
    %324 = vector.shape_cast %323 : vector<32x128xf32> to vector<2x16x128xf32>
    %325 = vector.shape_cast %315 : vector<2x128xf32> to vector<2x1x128xf32>
    %326 = vector.broadcast %325 : vector<2x1x128xf32> to vector<2x16x128xf32>
    %327 = arith.mulf %324, %326 : vector<2x16x128xf32>
    %328 = vector.shape_cast %327 : vector<2x16x128xf32> to vector<32x128xf32>
    %cst_88 = arith.constant 0.000000e+00 : f32
    %329 = vector.broadcast %cst_88 : f32 to vector<32x128xf32>
    %330 = arith.maximumf %328, %329 : vector<32x128xf32>
    %c32 = arith.constant 32 : index
    %c0_89 = arith.constant 0 : index
    %331 = vector.load %arg7[%c32, %c0_89] : memref<64x128xf32, #tpu.memory_space<vmem>>, vector<32x128xf32>
    tpu.vector_store %arg7[%c32, %c0_89], %330 {strides = array<i32>} : memref<64x128xf32, #tpu.memory_space<vmem>>, vector<32x128xf32>,
    return
  }
}

</mosaic_0001>

<bundles_post_ra>
// kernel: tpu_custom_call.1
= control target key start
LH: loop header
LB: loop body
LE: loop exit
PB: predicated region body
PF: predicated region fallthrough
CT: control target
= control target key end

     0   :  { %v2230_v2 = vmov 0   ;;  %vm113_vm0 = vcmask 1043456   ;;  %vm103_vm1 = vcmask 64512   ;;  %s2804_s0 = inlined_call_operand.vmem [shape: bf16[2,8,512], index: 0, kind: input, shape index: {}]   ;;  %s2805_s1 = inlined_call_operand.vmem [shape: bf16[2,48,8], index: 1, kind: input, shape index: {}]   ;;  %s2806_s2 = inlined_call_operand.vmem [shape: bf16[2,48,16], index: 2, kind: input, shape index: {}]   ;;  %s2807_s3 = inlined_call_operand.vmem [shape: f32[2,48,1], index: 3, kind: input, shape index: {}]   ;;  %s2808_s4 = inlined_call_operand.vmem [shape: f32[2,48,1], index: 4, kind: input, shape index: {}]   ;;  %s2809_s5 = inlined_call_operand.vmem [shape: bf16[2,2,16], index: 5, kind: input, shape index: {}]   ;;  %s2810_s6 = inlined_call_operand.vmem [shape: bf16[2,128,128], index: 6, kind: input, shape index: {}]   ;;  %s2811_s7 = inlined_call_operand.hbm [shape: f32[64,128], index: 7, kind: output, shape index: {}]  }
   0x1   :  { %v222_v0 = vld [vmem:[%s2808_s4] sm:$0xff]  ;;  %2031 = vset.pattern.permute.xlu1 %v2230_v2  ;;  %2030 = vset.pattern.permute.xlu0 %v2230_v2  ;;  %v44_v3 = vld [vmem:[%s2807_s3 + $0x10] sm:$0xff]  ;;  %v41_v5 = vld [vmem:[%s2804_s0 + $0x8] sm:$0xff] }
   0x2   :  { %v42_v1 = vld [vmem:[%s2807_s3] sm:$0xff]  ;;  %230 = vperm.xlu1 %2031, %v222_v0   ;;  %v97_v8 = vunpack.c.l.b16 %v41_v5  ;;  %v98_v9 = vunpack.c.h.b16 %v41_v5  ;;  %2032 = vset.pattern.permute.xlu2 %v2230_v2  ;;  %v1998_v19 = vld [vmem:[%s2805_s1 + $0x8] sm:$0xff] }
   0x3   :  { %v40_v4 = vld [vmem:[%s2804_s0] sm:$0xff]  ;;  %50 = vperm.xlu0 %2030, %v42_v1   ;;  %60 = vperm.xlu2 %2032, %v44_v3  }
   0x4   :  { %v95_v6 = vunpack.c.l.b16 %v40_v4  ;;  %v96_v7 = vunpack.c.h.b16 %v40_v4  ;;  %v101_v12 = vpack.c.b16 %v97_v8, %v97_v8  ;;  %v102_v13 = vpack.c.b16 %v98_v9, %v98_v9  ;;  %v1997_v18 = vld [vmem:[%s2805_s1] sm:$0xff] }
   0x6   :  { %v99_v10 = vpack.c.b16 %v95_v6, %v95_v6  ;;  %v100_v11 = vpack.c.b16 %v96_v7, %v96_v7  ;;  %v121_v16 = vsel %vm113_vm0, %v101_v12, 0  ;;  %v124_v17 = vsel %vm113_vm0, %v102_v13, 0 }
   0x8   :  { %v115_v14 = vsel %vm113_vm0, %v99_v10, 0  ;;  %v118_v15 = vsel %vm113_vm0, %v100_v11, 0 }
   0x9   :  { %133 = vmatpush.bf16.msra.mxu0 %v115_v14  ;;  %157 = vmatpush.bf16.msra.mxu1 %v118_v15 }
   0xa   :  { %12 = vsyncpa [#allocation3], 0  ;;  %2025 = vmatpush.bf16.msra.mxu2 %v121_v16  ;;  %205 = vmatpush.bf16.msra.mxu3 %v124_v17  ;;  %v223_v20 = vld [vmem:[%s2808_s4 + $0x8] sm:$0xff]  ;;  %v45_v22 = vld [vmem:[%s2807_s3 + $0x18] sm:$0xff]  ;;  %s1754_s23 = sshll.u32 %s2811_s7, 4  ;;  %s2232_s24 = smov 128   ;;  %s1755_s23 = int_to_ptr.hbm [resolvable:$true] %s1754_s23 }
   0xb   :  { %v43_v21 = vld [vmem:[%s2807_s3 + $0x8] sm:$0xff]  ;;  %235 = vperm.xlu1 %2031, %v223_v20   ;;  %65 = vperm.xlu2 %2032, %v45_v22   ;;  %v225_v23 = vld [vmem:[%s2808_s4 + $0x18] sm:$0xff]  ;;  %v224_v24 = vld [vmem:[%s2808_s4 + $0x10] sm:$0xff] }
   0xc   :  { %1778 = vmatmul.msk.bf16.vlgmr.msra.gmra.mxu0 %vm103_vm1, %v1997_v18  ;;  %1781 = vmatmul.msk.bf16.vlgmr.msra.gmra.mxu1 %vm103_vm1, %v1997_v18  ;;  %v46_v25 = vld [vmem:[%s2807_s3 + $0x20] sm:$0xff]  ;;  %v1999_v26 = vld [vmem:[%s2805_s1 + $0x10] sm:$0xff]  ;;  %v47_v28 = vld [vmem:[%s2807_s3 + $0x28] sm:$0xff] }
   0xd   :  { %181 = vmatpush.bf16.msrb.mxu0 %v121_v16  ;;  %1785 = vmatmul.msk.bf16.vlgmr.msra.gmra.mxu2 %vm103_vm1, %v1998_v19  ;;  %v226_v27 = vld [vmem:[%s2808_s4 + $0x20] sm:$0xff]  ;;  %v227_v29 = vld [vmem:[%s2808_s4 + $0x28] sm:$0xff]  ;;  %v1875_v30 = vld [vmem:[%s2807_s3 + $0x38] sm:$0xff] }
   0xe   :  { %1787 = vmatmul.msk.bf16.vlgmr.msra.gmra.mxu3 %vm103_vm1, %v1997_v18  ;;  %55 = vperm.xlu0 %2030, %v43_v21   ;;  %v1874_v31 = vld [vmem:[%s2807_s3 + $0x30] sm:$0xff]  ;;  %v1876_v33 = vld [vmem:[%s2807_s3 + $0x40] sm:$0xff]  ;;  %v1905_v34 = vld [vmem:[%s2808_s4 + $0x38] sm:$0xff] }
   0xf   :  { %v1904_v32 = vld [vmem:[%s2808_s4 + $0x30] sm:$0xff]  ;;  %v1877_v35 = vld [vmem:[%s2807_s3 + $0x48] sm:$0xff]  ;;  %v1906_v37 = vld [vmem:[%s2808_s4 + $0x40] sm:$0xff] }
  0x10   :  { %v1907_v36 = vld [vmem:[%s2808_s4 + $0x48] sm:$0xff]  ;;  %v1878_v38 = vld [vmem:[%s2807_s3 + $0x50] sm:$0xff]  ;;  %v1879_v40 = vld [vmem:[%s2807_s3 + $0x58] sm:$0xff] }
  0x11   :  { %v1908_v39 = vld [vmem:[%s2808_s4 + $0x50] sm:$0xff]  ;;  %v1909_v41 = vld [vmem:[%s2808_s4 + $0x58] sm:$0xff] }
  0x13   :  { %245 = vperm.xlu1 %2031, %v225_v23   ;;  %70 = vperm.xlu2 %2032, %v46_v25  }
  0x16   :  { %240 = vperm.xlu0 %2030, %v224_v24  }
  0x1b   :  { %250 = vperm.xlu1 %2031, %v226_v27   ;;  %255 = vperm.xlu2 %2032, %v227_v29  }
  0x1c   :  { %1779 = vmatmul.msk.bf16.gmra.mxu0 %vm103_vm1, %v1998_v19  ;;  %1782 = vmatmul.msk.bf16.gmra.mxu1 %vm103_vm1, %v1998_v19 }
  0x1d   :  { %1786 = vmatmul.msk.bf16.gmra.mxu2 %vm103_vm1, %v1999_v26 }
  0x1e   :  { %1788 = vmatmul.msk.bf16.gmra.mxu3 %vm103_vm1, %v1998_v19  ;;  %75 = vperm.xlu0 %2030, %v47_v28  }
  0x23   :  { %917 = vperm.xlu1 %2031, %v1875_v30   ;;  %1091 = vperm.xlu2 %2032, %v1904_v32  }
  0x26   :  { %912 = vperm.xlu0 %2030, %v1874_v31  }
  0x2b   :  { %922 = vperm.xlu1 %2031, %v1876_v33   ;;  %927 = vperm.xlu2 %2032, %v1877_v35  }
  0x2c   :  { %1780 = vmatmul.msk.bf16.gmra.mxu0 %vm103_vm1, %v1999_v26  ;;  %1783 = vmatmul.msk.bf16.gmra.mxu1 %vm103_vm1, %v1999_v26 }
  0x2e   :  { %1789 = vmatmul.msk.bf16.gmra.mxu3 %vm103_vm1, %v1999_v26  ;;  %1096 = vperm.xlu0 %2030, %v1905_v34  }
  0x33   :  { %1106 = vperm.xlu1 %2031, %v1907_v36   ;;  %932 = vperm.xlu2 %2032, %v1878_v38  }
  0x36   :  { %1101 = vperm.xlu0 %2030, %v1906_v37  }
  0x3b   :  { %1111 = vperm.xlu1 %2031, %v1908_v39   ;;  %1116 = vperm.xlu2 %2032, %v1909_v41  }
  0x3c   :  { %1784 = vmatmul.msk.bf16.vlgmr.msrb.gmra.mxu0 %vm103_vm1, %v1997_v18 }
  0x3e   :  { %937 = vperm.xlu0 %2030, %v1879_v40  }
  0x5d   :  { %v2389_v56 = vpop.permute.xlu2 %60 }
  0x65   :  { %v2395_v2 = vpop.permute.xlu2 %65 }
  0x6d   :  { %v2401_v16 = vpop.permute.xlu2 %70 }
  0x74   :  { %v2379_v44 = vpop.permute.xlu1 %230 }
  0x75   :  { %v2377_v42 = vpop.permute.xlu0 %50  ;;  %v2409_v40 = vpop.permute.xlu2 %255 }
  0x7d   :  { %v2386_v51 = vpop.permute.xlu1 %235 }
  0x80   :  { %v2383_v48 = vpop.permute.xlu0 %55 }
  0x85   :  { %v2398_v6 = vpop.permute.xlu1 %245 }
  0x88   :  { %v2392_v59 = vpop.permute.xlu0 %240 }
  0x89   :  { %v135_v43 = vpop.f32.mrf.mxu0 }
  0x8a   :  { %v136_v45 = vadd.f32 %v135_v43, %v2377_v42 }
  0x8c   :  { %v258_v46 = vadd.f32 %v2379_v44, %v136_v45 }
  0x8d   :  { %v2403_v31 = vpop.permute.xlu1 %250 }
  0x8e   :  { %v1790_v47 = vmul.f32 -1.442695, %v258_v46 }
  0x90   :  { %2033 = vpow2.f32 %v1790_v47  ;;  %v2407_v37 = vpop.permute.xlu0 %75 }
  0x91   :  { %v137_v49 = vpop.f32.mrf.mxu0 }
  0x92   :  { %v138_v50 = vadd.f32 %v137_v49, %v2383_v48 }
  0x94   :  { %v259_v52 = vadd.f32 %v2386_v51, %v138_v50 }
  0x96   :  { %v2034_v53 = vpop.eup %2033  ;;  %v1791_v55 = vmul.f32 -1.442695, %v259_v52 }
  0x97   :  { %v266_v54 = vadd.f32 1.0, %v2034_v53 }
  0x99   :  { %2035 = vrcp.f32 %v266_v54  ;;  %v140_v57 = vpop.f32.mrf.mxu0  ;;  %v279_v15 = vand.u32 2147483648, %v266_v54  ;;  %vm273_vm3 = vweird.f32 %v266_v54  ;;  %v277_v17 = vand.u32 2147483647, %v266_v54 }
  0x9a   :  { %2037 = vpow2.f32 %v1791_v55  ;;  %v141_v58 = vadd.f32 %v140_v57, %v2389_v56 }
  0x9b   :  { %v280_v22 = vor.u32 1.1754944e-38, %v279_v15  ;;  %vm278_vm5 = vcmp.eq.f32.partialorder %v277_v17, 8.507059e+37 }
  0x9c   :  { %v298_v60 = vadd.f32 %v2392_v59, %v141_v58 }
  0x9e   :  { %v1792_v62 = vmul.f32 -1.442695, %v298_v60 }
  0x9f   :  { %v2036_v61 = vpop.eup %2035 }
  0xa0   :  { %v2038_v63 = vpop.eup %2037  ;;  %v269_v0 = vmul.f32 %v2036_v61, %v266_v54  ;;  %2039 = vpow2.f32 %v1792_v62  ;;  %vm274_vm2 = vweird.f32 %v2036_v61 }
  0xa1   :  { %v267_v1 = vadd.f32 1.0, %v2038_v63  ;;  %v142_v3 = vpop.f32.mrf.mxu0  ;;  %vm275_vm4 = vmor %vm273_vm3, %vm274_vm2 }
  0xa2   :  { %v270_v4 = vsub.f32 1.0, %v269_v0  ;;  %v143_v5 = vadd.f32 %v142_v3, %v2395_v2 }
  0xa3   :  { %2041 = vrcp.f32 %v267_v1  ;;  %v294_v26 = vand.u32 2147483648, %v267_v1  ;;  %v292_v29 = vand.u32 2147483647, %v267_v1  ;;  %vm288_vm7 = vweird.f32 %v267_v1 }
  0xa4   :  { %v299_v7 = vadd.f32 %v2398_v6, %v143_v5  ;;  %v271_v8 = vmul.f32 %v2036_v61, %v270_v4 }
  0xa5   :  { %v295_v36 = vor.u32 1.1754944e-38, %v294_v26  ;;  %vm293_vm10 = vcmp.eq.f32.partialorder %v292_v29, 8.507059e+37 }
  0xa6   :  { %v2040_v9 = vpop.eup %2039  ;;  %v1793_v10 = vmul.f32 -1.442695, %v299_v7  ;;  %v272_v14 = vadd.f32 %v2036_v61, %v271_v8 }
  0xa7   :  { %v306_v11 = vadd.f32 1.0, %v2040_v9 }
  0xa8   :  { %2043 = vpow2.f32 %v1793_v10  ;;  %v276_v19 = vsel %vm275_vm4, %v2036_v61, %v272_v14  ;;  %vm368_vm4 = vcmask 130048  }
  0xa9   :  { %v2042_v12 = vpop.eup %2041  ;;  %2045 = vrcp.f32 %v306_v11  ;;  %v145_v13 = vpop.f32.mrf.mxu0  ;;  %v281_v28 = vsel %vm278_vm5, %v280_v22, %v276_v19  ;;  %v319_v41 = vand.u32 2147483648, %v306_v11  ;;  %vm313_vm11 = vweird.f32 %v306_v11  ;;  %v2439_v22 = vld [vmem:[%s2806_s2 + $0x10] sm:$0xff] }
  0xaa   :  { %v284_v18 = vmul.f32 %v2042_v12, %v267_v1  ;;  %vm289_vm6 = vweird.f32 %v2042_v12  ;;  %v146_v34 = vadd.f32 %v145_v13, %v2401_v16  ;;  %v338_v35 = vmul.f32 %v281_v28, %v2403_v31 }
  0xab   :  { %vm290_vm8 = vmor %vm288_vm7, %vm289_vm6  ;;  %v317_v47 = vand.u32 2147483647, %v306_v11  ;;  %v320_v55 = vor.u32 1.1754944e-38, %v319_v41 }
  0xac   :  { %v285_v20 = vsub.f32 1.0, %v284_v18  ;;  %v340_v52 = vadd.f32 %v338_v35, %v146_v34 }
  0xad   :  { %vm318_vm13 = vcmp.eq.f32.partialorder %v317_v47, 8.507059e+37 }
  0xae   :  { %v2044_v21 = vpop.eup %2043  ;;  %v286_v25 = vmul.f32 %v2042_v12, %v285_v20  ;;  %v2425_v20 = vld [vmem:[%s2806_s2] sm:$0xff] }
  0xaf   :  { %v2046_v23 = vpop.eup %2045  ;;  %v307_v24 = vadd.f32 1.0, %v2044_v21  ;;  %v2432_v21 = vld [vmem:[%s2806_s2 + $0x8] sm:$0xff] }
  0xb0   :  { %v309_v27 = vmul.f32 %v2046_v23, %v306_v11  ;;  %v287_v33 = vadd.f32 %v2042_v12, %v286_v25  ;;  %vm314_vm9 = vweird.f32 %v2046_v23 }
  0xb1   :  { %2047 = vrcp.f32 %v307_v24  ;;  %v147_v30 = vpop.f32.mrf.mxu0  ;;  %vm315_vm12 = vmor %vm313_vm11, %vm314_vm9  ;;  %v334_v62 = vand.u32 2147483648, %v307_v24  ;;  %v332_v1 = vand.u32 2147483647, %v307_v24  ;;  %vm328_vm15 = vweird.f32 %v307_v24 }
  0xb2   :  { %v310_v32 = vsub.f32 1.0, %v309_v27  ;;  %v291_v39 = vsel %vm290_vm8, %v2042_v12, %v287_v33  ;;  %v148_v43 = vadd.f32 %v147_v30, %v2407_v37  ;;  %2049 = vtanh.f32 %v340_v52 }
  0xb3   :  { %v296_v45 = vsel %vm293_vm10, %v295_v36, %v291_v39  ;;  %v335_v5 = vor.u32 1.1754944e-38, %v334_v62  ;;  %vm333_vm3 = vcmp.eq.f32.partialorder %v332_v1, 8.507059e+37 }
  0xb4   :  { %v311_v38 = vmul.f32 %v2046_v23, %v310_v32  ;;  %v339_v49 = vmul.f32 %v296_v45, %v2409_v40 }
  0xb6   :  { %v312_v46 = vadd.f32 %v2046_v23, %v311_v38  ;;  %v341_v57 = vadd.f32 %v339_v49, %v148_v43 }
  0xb7   :  { %v2048_v50 = vpop.eup %2047 }
  0xb8   :  { %v324_v53 = vmul.f32 %v2048_v50, %v307_v24  ;;  %v316_v54 = vsel %vm315_vm12, %v2046_v23, %v312_v46  ;;  %vm329_vm14 = vweird.f32 %v2048_v50  ;;  %2051 = vtanh.f32 %v341_v57  ;;  %v2050_v8 = vpop.eup %2049  ;;  %v159_v23 = vpop.f32.mrf.mxu1 }
  0xb9   :  { %v183_v58 = vpop.f32.mrf.mxu0  ;;  %v321_v63 = vsel %vm318_vm13, %v320_v55, %v316_v54  ;;  %vm330_vm2 = vmor %vm328_vm15, %vm329_vm14  ;;  %v160_v27 = vadd.f32 %v159_v23, %v2377_v42 }
  0xba   :  { %v325_v60 = vsub.f32 1.0, %v324_v53  ;;  %v2414_v61 = vadd.f32 %v183_v58, %v2377_v42  ;;  %v344_v3 = vsub.f32 1.0, %v321_v63  ;;  %v348_v14 = vmul.f32 0.0, %v321_v63 }
  0xbc   :  { %v326_v0 = vmul.f32 %v2048_v50, %v325_v60  ;;  %v346_v10 = vmul.f32 %v2050_v8, %v344_v3 }
  0xbe   :  { %v327_v4 = vadd.f32 %v2048_v50, %v326_v0  ;;  %v2052_v12 = vpop.eup %2051  ;;  %v2416_v17 = vadd.f32 %v348_v14, %v346_v10 }
  0xc0   :  { %v331_v7 = vsel %vm330_vm2, %v2048_v50, %v327_v4  ;;  %v161_v25 = vpop.f32.mrf.mxu1 }
  0xc1   :  { %v336_v9 = vsel %vm333_vm3, %v335_v5, %v331_v7  ;;  %v2443_v24 = vpop.f32.mrf.mxu0  ;;  %v162_v33 = vadd.f32 %v161_v25, %v2383_v48 }
  0xc2   :  { %v345_v11 = vsub.f32 1.0, %v336_v9  ;;  %v349_v15 = vmul.f32 0.0, %v336_v9 }
  0xc4   :  { %v347_v13 = vmul.f32 %v2052_v12, %v345_v11 }
  0xc6   :  { %v2418_v18 = vadd.f32 %v349_v15, %v347_v13 }
  0xc8   :  { %v352_v19 = vpack.c.bf16 %v2418_v18, %v2416_v17  ;;  %v164_v34 = vpop.f32.mrf.mxu1 }
  0xc9   :  { %v165_v45 = vadd.f32 %v164_v34, %v2389_v56 }
  0xca   :  { %385 = vmatpush.bf16.msra.mxu0 %v352_v19 }
  0xcd   :  { %1806 = vmatmul.msk.bf16.vlgmr.msra.gmra.mxu0 %vm368_vm4, %v2425_v20 }
  0xd0   :  { %v166_v47 = vpop.f32.mrf.mxu1 }
  0xd1   :  { %v167_v58 = vadd.f32 %v166_v47, %v2395_v2 }
  0xd8   :  { %v169_v4 = vpop.f32.mrf.mxu1 }
  0xd9   :  { %v170_v25 = vadd.f32 %v169_v4, %v2401_v16 }
  0xdd   :  { %1807 = vmatmul.msk.bf16.gmra.mxu0 %vm368_vm4, %v2432_v21 }
  0xed   :  { %1808 = vmatmul.msk.bf16.gmra.mxu0 %vm368_vm4, %v2439_v22 }
 0x14a   :  { %v387_v26 = vpop.f32.mrf.mxu0 }
 0x14b   :  { %v388_v28 = vadd.f32 %v387_v26, %v2379_v44 }
 0x14d   :  { %v402_v29 = vadd.f32 %v388_v28, %v160_v27 }
 0x14f   :  { %v1809_v30 = vmul.f32 -1.442695, %v402_v29 }
 0x151   :  { %2053 = vpow2.f32 %v1809_v30 }
 0x152   :  { %v389_v32 = vpop.f32.mrf.mxu0 }
 0x153   :  { %v390_v35 = vadd.f32 %v389_v32, %v2386_v51 }
 0x155   :  { %v403_v36 = vadd.f32 %v390_v35, %v162_v33 }
 0x157   :  { %v2054_v38 = vpop.eup %2053  ;;  %v1810_v39 = vmul.f32 -1.442695, %v403_v36  ;;  %v171_v36 = vpop.f32.mrf.mxu1 }
 0x158   :  { %v410_v41 = vadd.f32 1.0, %v2054_v38  ;;  %v172_v47 = vadd.f32 %v171_v36, %v2407_v37 }
 0x159   :  { %2055 = vpow2.f32 %v1810_v39 }
 0x15a   :  { %2057 = vrcp.f32 %v410_v41  ;;  %v392_v43 = vpop.f32.mrf.mxu0  ;;  %v423_v1 = vand.u32 2147483648, %v410_v41  ;;  %vm417_vm6 = vweird.f32 %v410_v41  ;;  %v421_v8 = vand.u32 2147483647, %v410_v41 }
 0x15b   :  { %v393_v46 = vadd.f32 %v392_v43, %v2392_v59 }
 0x15c   :  { %v424_v14 = vor.u32 1.1754944e-38, %v423_v1  ;;  %vm422_vm8 = vcmp.eq.f32.partialorder %v421_v8, 8.507059e+37 }
 0x15d   :  { %v442_v49 = vadd.f32 %v393_v46, %v165_v45 }
 0x15f   :  { %v2056_v50 = vpop.eup %2055  ;;  %v1811_v52 = vmul.f32 -1.442695, %v442_v49 }
 0x160   :  { %v2058_v53 = vpop.eup %2057  ;;  %v411_v54 = vadd.f32 1.0, %v2056_v50 }
 0x161   :  { %2059 = vpow2.f32 %v1811_v52  ;;  %v413_v55 = vmul.f32 %v2058_v53, %v410_v41  ;;  %vm418_vm5 = vweird.f32 %v2058_v53 }
 0x162   :  { %2061 = vrcp.f32 %v411_v54  ;;  %v394_v57 = vpop.f32.mrf.mxu0  ;;  %vm419_vm7 = vmor %vm417_vm6, %vm418_vm5  ;;  %v438_v28 = vand.u32 2147483648, %v411_v54  ;;  %vm432_vm10 = vweird.f32 %v411_v54  ;;  %v436_v33 = vand.u32 2147483647, %v411_v54 }
 0x163   :  { %v395_v60 = vadd.f32 %v394_v57, %v2398_v6  ;;  %v414_v62 = vsub.f32 1.0, %v413_v55 }
 0x164   :  { %v439_v43 = vor.u32 1.1754944e-38, %v438_v28  ;;  %vm437_vm12 = vcmp.eq.f32.partialorder %v436_v33, 8.507059e+37  ;;  %v2470_v28 = vld [vmem:[%s2804_s0 + $0x10] sm:$0xff]  ;;  %v2488_v33 = vld [vmem:[%s2805_s1 + $0x20] sm:$0xff] }
 0x165   :  { %v443_v63 = vadd.f32 %v395_v60, %v167_v58  ;;  %v415_v0 = vmul.f32 %v2058_v53, %v414_v62 }
 0x167   :  { %v2060_v3 = vpop.eup %2059  ;;  %v1812_v5 = vmul.f32 -1.442695, %v443_v63  ;;  %v416_v7 = vadd.f32 %v2058_v53, %v415_v0 }
 0x168   :  { %v2062_v9 = vpop.eup %2061  ;;  %v450_v10 = vadd.f32 1.0, %v2060_v3 }
 0x169   :  { %2063 = vpow2.f32 %v1812_v5  ;;  %v420_v11 = vsel %vm419_vm7, %v2058_v53, %v416_v7  ;;  %v428_v12 = vmul.f32 %v2062_v9, %v411_v54  ;;  %vm433_vm9 = vweird.f32 %v2062_v9 }
 0x16a   :  { %2065 = vrcp.f32 %v450_v10  ;;  %v397_v13 = vpop.f32.mrf.mxu0  ;;  %v425_v23 = vsel %vm422_vm8, %v424_v14, %v420_v11  ;;  %vm434_vm11 = vmor %vm432_vm10, %vm433_vm9  ;;  %v463_v50 = vand.u32 2147483648, %v450_v10  ;;  %v461_v54 = vand.u32 2147483647, %v450_v10 }
 0x16b   :  { %v398_v15 = vadd.f32 %v397_v13, %v2403_v31  ;;  %v429_v19 = vsub.f32 1.0, %v428_v12  ;;  %vm457_vm14 = vweird.f32 %v450_v10 }
 0x16c   :  { %v464_v60 = vor.u32 1.1754944e-38, %v463_v50  ;;  %vm462_vm2 = vcmp.eq.f32.partialorder %v461_v54, 8.507059e+37 }
 0x16d   :  { %v482_v26 = vmul.f32 %v425_v23, %v398_v15  ;;  %v430_v27 = vmul.f32 %v2062_v9, %v429_v19 }
 0x16f   :  { %v2064_v29 = vpop.eup %2063  ;;  %v484_v30 = vadd.f32 %v482_v26, %v170_v25  ;;  %v431_v32 = vadd.f32 %v2062_v9, %v430_v27 }
 0x170   :  { %v2066_v34 = vpop.eup %2065  ;;  %v451_v35 = vadd.f32 1.0, %v2064_v29  ;;  %v957_v29 = vunpack.c.l.b16 %v2470_v28 }
 0x171   :  { %v435_v38 = vsel %vm434_vm11, %v2062_v9, %v431_v32  ;;  %v453_v39 = vmul.f32 %v2066_v34, %v450_v10  ;;  %vm458_vm13 = vweird.f32 %v2066_v34 }
 0x172   :  { %2067 = vrcp.f32 %v451_v35  ;;  %v399_v41 = vpop.f32.mrf.mxu0  ;;  %v440_v49 = vsel %vm437_vm12, %v439_v43, %v435_v38  ;;  %vm459_vm15 = vmor %vm457_vm14, %vm458_vm13  ;;  %v476_v5 = vand.u32 2147483647, %v451_v35  ;;  %v478_v7 = vand.u32 2147483648, %v451_v35  ;;  %v188_v43 = vpop.f32.mrf.mxu2 }
 0x173   :  { %v400_v45 = vadd.f32 %v399_v41, %v2409_v40  ;;  %v454_v46 = vsub.f32 1.0, %v453_v39  ;;  %2069 = vtanh.f32 %v484_v30  ;;  %vm472_vm5 = vweird.f32 %v451_v35 }
 0x174   :  { %v479_v13 = vor.u32 1.1754944e-38, %v478_v7  ;;  %vm477_vm7 = vcmp.eq.f32.partialorder %v476_v5, 8.507059e+37  ;;  %v961_v30 = vpack.c.b16 %v957_v29, %v957_v29  ;;  %v189_v54 = vadd.f32 %v188_v43, %v2389_v56 }
 0x175   :  { %v483_v52 = vmul.f32 %v440_v49, %v400_v45  ;;  %v455_v53 = vmul.f32 %v2066_v34, %v454_v46  ;;  %v186_v45 = vadd.f32 %v2443_v24, %v2383_v48 }
 0x176   :  { %v975_v32 = vsel %vm113_vm0, %v961_v30, 0 }
 0x177   :  { %v485_v55 = vadd.f32 %v483_v52, %v172_v47  ;;  %v456_v57 = vadd.f32 %v2066_v34, %v455_v53 }
 0x178   :  { %v2068_v58 = vpop.eup %2067 }
 0x179   :  { %v460_v62 = vsel %vm459_vm15, %v2066_v34, %v456_v57  ;;  %v468_v63 = vmul.f32 %v2068_v58, %v451_v35  ;;  %v2070_v4 = vpop.eup %2069  ;;  %vm473_vm3 = vweird.f32 %v2068_v58  ;;  %2071 = vtanh.f32 %v485_v55  ;;  %v2495_v34 = vld [vmem:[%s2805_s1 + $0x28] sm:$0xff] }
 0x17a   :  { %v465_v0 = vsel %vm462_vm2, %v464_v60, %v460_v62  ;;  %vm474_vm6 = vmor %vm472_vm5, %vm473_vm3  ;;  %v190_v55 = vpop.f32.mrf.mxu2 }
 0x17b   :  { %v469_v1 = vsub.f32 1.0, %v468_v63  ;;  %v488_v3 = vsub.f32 1.0, %v465_v0  ;;  %v492_v11 = vmul.f32 %v465_v0, %v2416_v17 }
 0x17d   :  { %v470_v8 = vmul.f32 %v2068_v58, %v469_v1  ;;  %v490_v9 = vmul.f32 %v2070_v4, %v488_v3  ;;  %v191_v1 = vadd.f32 %v190_v55, %v2395_v2 }
 0x17f   :  { %v471_v12 = vadd.f32 %v2068_v58, %v470_v8  ;;  %v2458_v10 = vadd.f32 %v492_v11, %v490_v9  ;;  %v2072_v23 = vpop.eup %2071 }
 0x181   :  { %v475_v14 = vsel %vm474_vm6, %v2068_v58, %v471_v12 }
 0x182   :  { %v480_v15 = vsel %vm477_vm7, %v479_v13, %v475_v14  ;;  %v193_v11 = vpop.f32.mrf.mxu2 }
 0x183   :  { %v489_v19 = vsub.f32 1.0, %v480_v15  ;;  %v493_v26 = vmul.f32 %v480_v15, %v2418_v18  ;;  %v2481_v18 = vld [vmem:[%s2805_s1 + $0x18] sm:$0xff] }
 0x185   :  { %v491_v25 = vmul.f32 %v2072_v23, %v489_v19 }
 0x187   :  { %v2461_v27 = vadd.f32 %v493_v26, %v491_v25 }
 0x189   :  { %v496_v17 = vpack.c.bf16 %v2461_v27, %v2458_v10 }
 0x18b   :  { %504 = vmatpush.bf16.msrb.mxu1 %v496_v17 }
 0x18e   :  { %1813 = vmatmul.msk.bf16.vlgmr.msrb.gmra.mxu1 %vm368_vm4, %v2425_v20 }
 0x18f   :  { %993 = vmatpush.bf16.msra.mxu1 %v975_v32 }
 0x19e   :  { %1814 = vmatmul.msk.bf16.gmra.mxu1 %vm368_vm4, %v2432_v21 }
 0x1ae   :  { %1815 = vmatmul.msk.bf16.gmra.mxu1 %vm368_vm4, %v2439_v22 }
 0x1be   :  { %1892 = vmatmul.msk.bf16.vlgmr.msra.gmra.mxu1 %vm103_vm1, %v2481_v18 }
 0x1ce   :  { %1893 = vmatmul.msk.bf16.gmra.mxu1 %vm103_vm1, %v2488_v33 }
 0x1de   :  { %1894 = vmatmul.msk.bf16.gmra.mxu1 %vm103_vm1, %v2495_v34 }
 0x20b   :  { %v506_v35 = vpop.f32.mrf.mxu1 }
 0x20c   :  { %v507_v36 = vadd.f32 %v506_v35, %v2379_v44  ;;  %v194_v35 = vadd.f32 %v193_v11, %v2401_v16 }
 0x20e   :  { %v521_v38 = vadd.f32 %v507_v36, %v2414_v61 }
 0x210   :  { %v1816_v39 = vmul.f32 -1.442695, %v521_v38 }
 0x212   :  { %2073 = vpow2.f32 %v1816_v39 }
 0x213   :  { %v508_v41 = vpop.f32.mrf.mxu1 }
 0x214   :  { %v509_v46 = vadd.f32 %v508_v41, %v2386_v51 }
 0x216   :  { %v522_v47 = vadd.f32 %v509_v46, %v186_v45 }
 0x218   :  { %v2074_v49 = vpop.eup %2073  ;;  %v1817_v50 = vmul.f32 -1.442695, %v522_v47 }
 0x219   :  { %v529_v52 = vadd.f32 1.0, %v2074_v49 }
 0x21a   :  { %2075 = vpow2.f32 %v1817_v50  ;;  %v195_v50 = vpop.f32.mrf.mxu2 }
 0x21b   :  { %2077 = vrcp.f32 %v529_v52  ;;  %v511_v53 = vpop.f32.mrf.mxu1  ;;  %v542_v8 = vand.u32 2147483648, %v529_v52  ;;  %vm536_vm9 = vweird.f32 %v529_v52  ;;  %v540_v14 = vand.u32 2147483647, %v529_v52 }
 0x21c   :  { %v512_v61 = vadd.f32 %v511_v53, %v2392_v59 }
 0x21d   :  { %v543_v17 = vor.u32 1.1754944e-38, %v542_v8  ;;  %vm541_vm11 = vcmp.eq.f32.partialorder %v540_v14, 8.507059e+37 }
 0x21e   :  { %v561_v57 = vadd.f32 %v512_v61, %v189_v54 }
 0x220   :  { %v2076_v58 = vpop.eup %2075  ;;  %v1818_v60 = vmul.f32 -1.442695, %v561_v57 }
 0x221   :  { %v2078_v62 = vpop.eup %2077  ;;  %v530_v63 = vadd.f32 1.0, %v2076_v58  ;;  %v196_v58 = vadd.f32 %v195_v50, %v2407_v37 }
 0x222   :  { %2079 = vpow2.f32 %v1818_v60  ;;  %v532_v24 = vmul.f32 %v2078_v62, %v529_v52  ;;  %vm537_vm8 = vweird.f32 %v2078_v62 }
 0x223   :  { %2081 = vrcp.f32 %v530_v63  ;;  %v513_v0 = vpop.f32.mrf.mxu1  ;;  %vm538_vm10 = vmor %vm536_vm9, %vm537_vm8  ;;  %v557_v39 = vand.u32 2147483648, %v530_v63  ;;  %vm551_vm13 = vweird.f32 %v530_v63  ;;  %v555_v46 = vand.u32 2147483647, %v530_v63 }
 0x224   :  { %v514_v3 = vadd.f32 %v513_v0, %v2398_v6  ;;  %v533_v4 = vsub.f32 1.0, %v532_v24 }
 0x225   :  { %v558_v61 = vor.u32 1.1754944e-38, %v557_v39  ;;  %vm556_vm15 = vcmp.eq.f32.partialorder %v555_v46, 8.507059e+37  ;;  %v2521_v39 = vpop.permute.xlu1 %917 }
 0x226   :  { %v562_v5 = vadd.f32 %v514_v3, %v191_v1  ;;  %v534_v7 = vmul.f32 %v2078_v62, %v533_v4 }
 0x228   :  { %v2080_v9 = vpop.eup %2079  ;;  %v1819_v12 = vmul.f32 -1.442695, %v562_v5  ;;  %v535_v13 = vadd.f32 %v2078_v62, %v534_v7  ;;  %v2512_v5 = vpop.permute.xlu0 %912 }
 0x229   :  { %v2082_v15 = vpop.eup %2081  ;;  %v569_v19 = vadd.f32 1.0, %v2080_v9 }
 0x22a   :  { %2083 = vpow2.f32 %v1819_v12  ;;  %v539_v23 = vsel %vm538_vm10, %v2078_v62, %v535_v13  ;;  %v547_v25 = vmul.f32 %v2082_v15, %v530_v63  ;;  %vm552_vm12 = vweird.f32 %v2082_v15 }
 0x22b   :  { %2085 = vrcp.f32 %v569_v19  ;;  %v516_v26 = vpop.f32.mrf.mxu1  ;;  %v544_v32 = vsel %vm541_vm11, %v543_v17, %v539_v23  ;;  %vm553_vm14 = vmor %vm551_vm13, %vm552_vm12  ;;  %v582_v62 = vand.u32 2147483648, %v569_v19  ;;  %v580_v63 = vand.u32 2147483647, %v569_v19 }
 0x22c   :  { %v517_v29 = vadd.f32 %v516_v26, %v2403_v31  ;;  %v548_v30 = vsub.f32 1.0, %v547_v25  ;;  %vm576_vm3 = vweird.f32 %v569_v19  ;;  %v2515_v25 = vpop.permute.xlu2 %1091 }
 0x22d   :  { %v583_v7 = vor.u32 1.1754944e-38, %v582_v62  ;;  %vm581_vm6 = vcmp.eq.f32.partialorder %v580_v63, 8.507059e+37  ;;  %v2532_v62 = vpop.permute.xlu1 %922 }
 0x22e   :  { %v601_v36 = vmul.f32 %v544_v32, %v517_v29  ;;  %v549_v38 = vmul.f32 %v2082_v15, %v548_v30 }
 0x230   :  { %v2084_v41 = vpop.eup %2083  ;;  %v603_v43 = vadd.f32 %v601_v36, %v194_v35  ;;  %v550_v45 = vadd.f32 %v2082_v15, %v549_v38 }
 0x231   :  { %v2086_v47 = vpop.eup %2085  ;;  %v570_v49 = vadd.f32 1.0, %v2084_v41 }
 0x232   :  { %v554_v52 = vsel %vm553_vm14, %v2082_v15, %v550_v45  ;;  %v572_v53 = vmul.f32 %v2086_v47, %v569_v19  ;;  %vm577_vm2 = vweird.f32 %v2086_v47  ;;  %v2523_v45 = vpop.permute.xlu0 %1096 }
 0x233   :  { %2087 = vrcp.f32 %v570_v49  ;;  %v518_v54 = vpop.f32.mrf.mxu1  ;;  %v559_v60 = vsel %vm556_vm15, %v558_v61, %v554_v52  ;;  %vm578_vm5 = vmor %vm576_vm3, %vm577_vm2  ;;  %v595_v26 = vand.u32 2147483647, %v570_v49  ;;  %v597_v19 = vand.u32 2147483648, %v570_v49 }
 0x234   :  { %v519_v55 = vadd.f32 %v518_v54, %v2409_v40  ;;  %v573_v57 = vsub.f32 1.0, %v572_v53  ;;  %2089 = vtanh.f32 %v603_v43  ;;  %vm591_vm8 = vweird.f32 %v570_v49 }
 0x235   :  { %v598_v41 = vor.u32 1.1754944e-38, %v597_v19  ;;  %vm596_vm10 = vcmp.eq.f32.partialorder %v595_v26, 8.507059e+37 }
 0x236   :  { %v602_v24 = vmul.f32 %v559_v60, %v519_v55  ;;  %v574_v0 = vmul.f32 %v2086_v47, %v573_v57 }
 0x238   :  { %v604_v1 = vadd.f32 %v602_v24, %v196_v58  ;;  %v575_v3 = vadd.f32 %v2086_v47, %v574_v0 }
 0x239   :  { %v2088_v4 = vpop.eup %2087 }
 0x23a   :  { %v579_v8 = vsel %vm578_vm5, %v2086_v47, %v575_v3  ;;  %v587_v9 = vmul.f32 %v2088_v4, %v570_v49  ;;  %v2090_v23 = vpop.eup %2089  ;;  %vm592_vm7 = vweird.f32 %v2088_v4  ;;  %2091 = vtanh.f32 %v604_v1  ;;  %v2535_v63 = vpop.permute.xlu0 %1101 }
 0x23b   :  { %v995_v11 = vpop.f32.mrf.mxu1  ;;  %v584_v12 = vsel %vm581_vm6, %v583_v7, %v579_v8  ;;  %vm593_vm9 = vmor %vm591_vm8, %vm592_vm7  ;;  %v2540_v8 = vpop.permute.xlu2 %927 }
 0x23c   :  { %v996_v13 = vadd.f32 %v995_v11, %v2512_v5  ;;  %v588_v14 = vsub.f32 1.0, %v587_v9  ;;  %v607_v15 = vsub.f32 1.0, %v584_v12  ;;  %v611_v32 = vmul.f32 %v584_v12, %v2458_v10 }
 0x23e   :  { %v1119_v17 = vadd.f32 %v2515_v25, %v996_v13  ;;  %v589_v29 = vmul.f32 %v2088_v4, %v588_v14  ;;  %v609_v30 = vmul.f32 %v2090_v23, %v607_v15  ;;  %v2543_v14 = vpop.permute.xlu1 %1106  ;;  %v958_v23 = vunpack.c.h.b16 %v2470_v28 }
 0x240   :  { %v1910_v35 = vmul.f32 -1.442695, %v1119_v17  ;;  %v590_v36 = vadd.f32 %v2088_v4, %v589_v29  ;;  %v2519_v38 = vadd.f32 %v611_v32, %v609_v30  ;;  %v2092_v52 = vpop.eup %2091  ;;  %v962_v30 = vpack.c.b16 %v958_v23, %v958_v23 }
 0x242   :  { %2093 = vpow2.f32 %v1910_v35  ;;  %v594_v43 = vsel %vm593_vm9, %v2088_v4, %v590_v36  ;;  %v978_v28 = vsel %vm113_vm0, %v962_v30, 0 }
 0x243   :  { %v997_v46 = vpop.f32.mrf.mxu1  ;;  %v599_v47 = vsel %vm596_vm10, %v598_v41, %v594_v43  ;;  %v2547_v41 = vpop.permute.xlu2 %932 }
 0x244   :  { %v998_v50 = vadd.f32 %v997_v46, %v2521_v39  ;;  %v608_v10 = vsub.f32 1.0, %v599_v47  ;;  %v612_v54 = vmul.f32 %v599_v47, %v2461_v27 }
 0x246   :  { %v1120_v53 = vadd.f32 %v2523_v45, %v998_v50  ;;  %v610_v49 = vmul.f32 %v2092_v52, %v608_v10 }
 0x248   :  { %v2094_v61 = vpop.eup %2093  ;;  %v1911_v55 = vmul.f32 -1.442695, %v1120_v53  ;;  %v2528_v57 = vadd.f32 %v612_v54, %v610_v49 }
 0x249   :  { %v1127_v58 = vadd.f32 1.0, %v2094_v61 }
 0x24a   :  { %2095 = vpow2.f32 %v1911_v55  ;;  %v615_v60 = vpack.c.bf16 %v2528_v57, %v2519_v38 }
 0x24b   :  { %2097 = vrcp.f32 %v1127_v58  ;;  %v1000_v24 = vpop.f32.mrf.mxu1  ;;  %v1140_v43 = vand.u32 2147483648, %v1127_v58  ;;  %vm1134_vm12 = vweird.f32 %v1127_v58  ;;  %v1138_v47 = vand.u32 2147483647, %v1127_v58 }
 0x24c   :  { %v1001_v0 = vadd.f32 %v1000_v24, %v2532_v62  ;;  %623 = vmatpush.bf16.msrb.mxu2 %v615_v60 }
 0x24d   :  { %v1141_v61 = vor.u32 1.1754944e-38, %v1140_v43  ;;  %vm1139_vm2 = vcmp.eq.f32.partialorder %v1138_v47, 8.507059e+37 }
 0x24e   :  { %v1159_v27 = vadd.f32 %v2535_v63, %v1001_v0 }
 0x24f   :  { %1820 = vmatmul.msk.bf16.vlgmr.msrb.gmra.mxu2 %vm368_vm4, %v2425_v20 }
 0x250   :  { %v2096_v1 = vpop.eup %2095  ;;  %v1912_v3 = vmul.f32 -1.442695, %v1159_v27  ;;  %1017 = vmatpush.bf16.msra.mxu2 %v978_v28 }
 0x251   :  { %v2098_v4 = vpop.eup %2097  ;;  %v1128_v7 = vadd.f32 1.0, %v2096_v1 }
 0x252   :  { %2099 = vpow2.f32 %v1912_v3  ;;  %v1130_v9 = vmul.f32 %v2098_v4, %v1127_v58  ;;  %vm1135_vm11 = vweird.f32 %v2098_v4  ;;  %v2558_v3 = vpop.permute.xlu1 %1111 }
 0x253   :  { %2101 = vrcp.f32 %v1128_v7  ;;  %v1002_v11 = vpop.f32.mrf.mxu1  ;;  %vm2550_vm13 = vmor %vm1134_vm12, %vm1135_vm11  ;;  %v1155_v52 = vand.u32 2147483648, %v1128_v7  ;;  %v1153_v49 = vand.u32 2147483647, %v1128_v7  ;;  %vm1149_vm15 = vweird.f32 %v1128_v7 }
 0x254   :  { %v1003_v12 = vadd.f32 %v1002_v11, %v2540_v8  ;;  %v1131_v13 = vsub.f32 1.0, %v1130_v9 }
 0x255   :  { %v1156_v1 = vor.u32 1.1754944e-38, %v1155_v52  ;;  %vm1154_vm5 = vcmp.eq.f32.partialorder %v1153_v49, 8.507059e+37 }
 0x256   :  { %v1160_v15 = vadd.f32 %v2543_v14, %v1003_v12  ;;  %v1132_v20 = vmul.f32 %v2098_v4, %v1131_v13  ;;  %v2564_v13 = vpop.permute.xlu0 %937 }
 0x258   :  { %v2100_v26 = vpop.eup %2099  ;;  %v1913_v19 = vmul.f32 -1.442695, %v1160_v15  ;;  %v1133_v36 = vadd.f32 %v2098_v4, %v1132_v20 }
 0x259   :  { %v2102_v17 = vpop.eup %2101  ;;  %v1167_v29 = vadd.f32 1.0, %v2100_v26 }
 0x25a   :  { %2103 = vpow2.f32 %v1913_v19  ;;  %v1145_v32 = vmul.f32 %v2102_v17, %v1128_v7  ;;  %vm1150_vm14 = vweird.f32 %v2102_v17  ;;  %v1137_v53 = vsel %vm2550_vm13, %v2098_v4, %v1133_v36  ;;  %v2562_v7 = vpop.permute.xlu2 %1116 }
 0x25b   :  { %2105 = vrcp.f32 %v1167_v29  ;;  %v1005_v35 = vpop.f32.mrf.mxu1  ;;  %vm1151_vm3 = vmor %vm1149_vm15, %vm1150_vm14  ;;  %v1142_v0 = vsel %vm1139_vm2, %v1141_v61, %v1137_v53  ;;  %v1180_v23 = vand.u32 2147483648, %v1167_v29  ;;  %vm1174_vm7 = vweird.f32 %v1167_v29 }
 0x25c   :  { %v1146_v46 = vsub.f32 1.0, %v1145_v32  ;;  %v1006_v11 = vadd.f32 %v1005_v35, %v2547_v41  ;;  %v1199_v12 = vmul.f32 %v1142_v0, %v2558_v3 }
 0x25d   :  { %v1181_v43 = vor.u32 1.1754944e-38, %v1180_v23 }
 0x25e   :  { %v1147_v10 = vmul.f32 %v2102_v17, %v1146_v46  ;;  %v1201_v32 = vadd.f32 %v1199_v12, %v1006_v11  ;;  %v2588_v11 = vld [vmem:[%s2806_s2 + $0x20] sm:$0xff]  ;;  %v2597_v12 = vld [vmem:[%s2806_s2 + $0x28] sm:$0xff] }
 0x25f   :  { %1821 = vmatmul.msk.bf16.gmra.mxu2 %vm368_vm4, %v2432_v21 }
 0x260   :  { %v2104_v54 = vpop.eup %2103  ;;  %v1148_v55 = vadd.f32 %v2102_v17, %v1147_v10 }
 0x261   :  { %v2106_v58 = vpop.eup %2105  ;;  %v1168_v60 = vadd.f32 1.0, %v2104_v54 }
 0x262   :  { %v1170_v24 = vmul.f32 %v2106_v58, %v1167_v29  ;;  %v1152_v27 = vsel %vm1151_vm3, %v2102_v17, %v1148_v55  ;;  %vm1175_vm6 = vweird.f32 %v2106_v58  ;;  %v1178_v17 = vand.u32 2147483647, %v1167_v29 }
 0x263   :  { %2107 = vrcp.f32 %v1168_v60  ;;  %v1007_v9 = vpop.f32.mrf.mxu1  ;;  %v1157_v21 = vsel %vm1154_vm5, %v1156_v1, %v1152_v27  ;;  %vm1176_vm8 = vmor %vm1174_vm7, %vm1175_vm6  ;;  %v1195_v28 = vand.u32 2147483648, %v1168_v60  ;;  %v1193_v52 = vand.u32 2147483647, %v1168_v60 }
 0x264   :  { %v1171_v4 = vsub.f32 1.0, %v1170_v24  ;;  %v1008_v20 = vadd.f32 %v1007_v9, %v2564_v13  ;;  %v1200_v26 = vmul.f32 %v1157_v21, %v2562_v7  ;;  %vm1179_vm9 = vcmp.eq.f32.partialorder %v1178_v17, 8.507059e+37 }
 0x265   :  { %2109 = vtanh.f32 %v1201_v32  ;;  %vm1189_vm11 = vweird.f32 %v1168_v60  ;;  %v1196_v49 = vor.u32 1.1754944e-38, %v1195_v28  ;;  %vm1194_vm13 = vcmp.eq.f32.partialorder %v1193_v52, 8.507059e+37 }
 0x266   :  { %v1172_v15 = vmul.f32 %v2106_v58, %v1171_v4  ;;  %v1202_v46 = vadd.f32 %v1200_v26, %v1008_v20 }
 0x268   :  { %v1173_v19 = vadd.f32 %v2106_v58, %v1172_v15  ;;  %2111 = vtanh.f32 %v1202_v46 }
 0x269   :  { %v2108_v30 = vpop.eup %2107 }
 0x26a   :  { %v1185_v35 = vmul.f32 %v2108_v30, %v1168_v60  ;;  %v1177_v36 = vsel %vm1176_vm8, %v2106_v58, %v1173_v19  ;;  %vm1190_vm10 = vweird.f32 %v2108_v30  ;;  %v2579_v60 = vld [vmem:[%s2806_s2 + $0x18] sm:$0xff] }
 0x26b   :  { %v1182_v50 = vsel %vm1179_vm9, %v1181_v43, %v1177_v36  ;;  %vm1191_vm12 = vmor %vm1189_vm11, %vm1190_vm10  ;;  %v2110_v61 = vpop.eup %2109 }
 0x26c   :  { %v1186_v47 = vsub.f32 1.0, %v1185_v35  ;;  %v1205_v29 = vsub.f32 1.0, %v1182_v50  ;;  %v1209_v1 = vmul.f32 0.0, %v1182_v50 }
 0x26e   :  { %v1187_v10 = vmul.f32 %v2108_v30, %v1186_v47  ;;  %v1207_v58 = vmul.f32 %v2110_v61, %v1205_v29  ;;  %v2112_v0 = vpop.eup %2111 }
 0x26f   :  { %1822 = vmatmul.msk.bf16.gmra.mxu2 %vm368_vm4, %v2439_v22 }
 0x270   :  { %v1188_v53 = vadd.f32 %v2108_v30, %v1187_v10  ;;  %v2570_v9 = vadd.f32 %v1209_v1, %v1207_v58 }
 0x272   :  { %v1192_v54 = vsel %vm1191_vm12, %v2108_v30, %v1188_v53 }
 0x273   :  { %v1197_v55 = vsel %vm1194_vm13, %v1196_v49, %v1192_v54 }
 0x274   :  { %v1206_v24 = vsub.f32 1.0, %v1197_v55  ;;  %v1210_v4 = vmul.f32 0.0, %v1197_v55 }
 0x276   :  { %v1208_v27 = vmul.f32 %v2112_v0, %v1206_v24 }
 0x278   :  { %v2572_v21 = vadd.f32 %v1210_v4, %v1208_v27 }
 0x27a   :  { %v1213_v22 = vpack.c.bf16 %v2572_v21, %v2570_v9 }
 0x27c   :  { %1245 = vmatpush.bf16.msrb.mxu1 %v1213_v22 }
 0x27f   :  { %1895 = vmatmul.msk.bf16.vlgmr.msra.gmra.mxu2 %vm103_vm1, %v2481_v18  ;;  %1926 = vmatmul.msk.bf16.vlgmr.msrb.gmra.mxu1 %vm368_vm4, %v2579_v60  ;;  %v207_v18 = vpop.f32.mrf.mxu3 }
 0x280   :  { %v208_v20 = vadd.f32 %v207_v18, %v2377_v42 }
 0x287   :  { %v209_v15 = vpop.f32.mrf.mxu3 }
 0x288   :  { %v210_v30 = vadd.f32 %v209_v15, %v2383_v48 }
 0x28f   :  { %1896 = vmatmul.msk.bf16.gmra.mxu2 %vm103_vm1, %v2488_v33  ;;  %1927 = vmatmul.msk.bf16.gmra.mxu1 %vm368_vm4, %v2588_v11  ;;  %v212_v32 = vpop.f32.mrf.mxu3 }
 0x290   :  { %v213_v42 = vadd.f32 %v212_v32, %v2389_v56 }
 0x297   :  { %v214_v28 = vpop.f32.mrf.mxu3 }
 0x298   :  { %v215_v49 = vadd.f32 %v214_v28, %v2395_v2 }
 0x29f   :  { %1897 = vmatmul.msk.bf16.gmra.mxu2 %vm103_vm1, %v2495_v34  ;;  %1928 = vmatmul.msk.bf16.gmra.mxu1 %vm368_vm4, %v2597_v12  ;;  %v217_v24 = vpop.f32.mrf.mxu3 }
 0x2d2   :  { %v625_v23 = vpop.f32.mrf.mxu2 }
 0x2d3   :  { %v626_v33 = vadd.f32 %v625_v23, %v2379_v44 }
 0x2d5   :  { %v640_v26 = vadd.f32 %v626_v33, %v208_v20 }
 0x2d7   :  { %v1823_v19 = vmul.f32 -1.442695, %v640_v26  ;;  %v218_v26 = vadd.f32 %v217_v24, %v2401_v16 }
 0x2d9   :  { %2113 = vpow2.f32 %v1823_v19 }
 0x2da   :  { %v627_v17 = vpop.f32.mrf.mxu2 }
 0x2db   :  { %v628_v35 = vadd.f32 %v627_v17, %v2386_v51 }
 0x2dd   :  { %v641_v34 = vadd.f32 %v628_v35, %v210_v30 }
 0x2df   :  { %v2114_v36 = vpop.eup %2113  ;;  %v1824_v43 = vmul.f32 -1.442695, %v641_v34 }
 0x2e0   :  { %v648_v46 = vadd.f32 1.0, %v2114_v36 }
 0x2e1   :  { %2115 = vpow2.f32 %v1824_v43 }
 0x2e2   :  { %2117 = vrcp.f32 %v648_v46  ;;  %v630_v47 = vpop.f32.mrf.mxu2  ;;  %v661_v56 = vand.u32 2147483648, %v648_v46  ;;  %vm655_vm15 = vweird.f32 %v648_v46  ;;  %v659_v1 = vand.u32 2147483647, %v648_v46 }
 0x2e3   :  { %v631_v44 = vadd.f32 %v630_v47, %v2392_v59  ;;  %v219_v47 = vpop.f32.mrf.mxu3 }
 0x2e4   :  { %vm660_vm3 = vcmp.eq.f32.partialorder %v659_v1, 8.507059e+37 }
 0x2e5   :  { %v680_v50 = vadd.f32 %v631_v44, %v213_v42 }
 0x2e7   :  { %v2116_v10 = vpop.eup %2115  ;;  %v1825_v52 = vmul.f32 -1.442695, %v680_v50 }
 0x2e8   :  { %v2118_v29 = vpop.eup %2117  ;;  %v649_v48 = vadd.f32 1.0, %v2116_v10  ;;  %v220_v10 = vadd.f32 %v219_v47, %v2407_v37 }
 0x2e9   :  { %2119 = vpow2.f32 %v1825_v52  ;;  %v651_v53 = vmul.f32 %v2118_v29, %v648_v46  ;;  %vm656_vm14 = vweird.f32 %v2118_v29 }
 0x2ea   :  { %2121 = vrcp.f32 %v649_v48  ;;  %v632_v51 = vpop.f32.mrf.mxu2  ;;  %vm657_vm2 = vmor %vm655_vm15, %vm656_vm14  ;;  %v676_v30 = vand.u32 2147483648, %v649_v48  ;;  %vm670_vm6 = vweird.f32 %v649_v48  ;;  %v674_v36 = vand.u32 2147483647, %v649_v48 }
 0x2eb   :  { %v633_v54 = vadd.f32 %v632_v51, %v2398_v6  ;;  %v652_v61 = vsub.f32 1.0, %v651_v53  ;;  %v662_v6 = vor.u32 1.1754944e-38, %v661_v56 }
 0x2ec   :  { %v677_v28 = vor.u32 1.1754944e-38, %v676_v30  ;;  %vm675_vm8 = vcmp.eq.f32.partialorder %v674_v36, 8.507059e+37 }
 0x2ed   :  { %v681_v55 = vadd.f32 %v633_v54, %v215_v49  ;;  %v653_v58 = vmul.f32 %v2118_v29, %v652_v61 }
 0x2ef   :  { %v2120_v59 = vpop.eup %2119  ;;  %v1826_v0 = vmul.f32 -1.442695, %v681_v55  ;;  %v654_v27 = vadd.f32 %v2118_v29, %v653_v58 }
 0x2f0   :  { %v2122_v4 = vpop.eup %2121  ;;  %v688_v22 = vadd.f32 1.0, %v2120_v59 }
 0x2f1   :  { %2123 = vpow2.f32 %v1826_v0  ;;  %v658_v18 = vsel %vm657_vm2, %v2118_v29, %v654_v27  ;;  %v666_v15 = vmul.f32 %v2122_v4, %v649_v48  ;;  %vm671_vm5 = vweird.f32 %v2122_v4 }
 0x2f2   :  { %2125 = vrcp.f32 %v688_v22  ;;  %v635_v2 = vpop.f32.mrf.mxu2  ;;  %v663_v33 = vsel %vm660_vm3, %v662_v6, %v658_v18  ;;  %vm672_vm7 = vmor %vm670_vm6, %vm671_vm5  ;;  %v701_v53 = vand.u32 2147483648, %v688_v22  ;;  %v699_v49 = vand.u32 2147483647, %v688_v22 }
 0x2f3   :  { %v636_v23 = vadd.f32 %v635_v2, %v2403_v31  ;;  %v667_v20 = vsub.f32 1.0, %v666_v15  ;;  %vm695_vm10 = vweird.f32 %v688_v22 }
 0x2f4   :  { %v702_v58 = vor.u32 1.1754944e-38, %v701_v53  ;;  %vm700_vm12 = vcmp.eq.f32.partialorder %v699_v49, 8.507059e+37 }
 0x2f5   :  { %v720_v19 = vmul.f32 %v663_v33, %v636_v23  ;;  %v668_v17 = vmul.f32 %v2122_v4, %v667_v20 }
 0x2f7   :  { %v2124_v32 = vpop.eup %2123  ;;  %v722_v35 = vadd.f32 %v720_v19, %v218_v26  ;;  %v669_v34 = vadd.f32 %v2122_v4, %v668_v17 }
 0x2f8   :  { %v2126_v43 = vpop.eup %2125  ;;  %v689_v46 = vadd.f32 1.0, %v2124_v32 }
 0x2f9   :  { %v691_v42 = vmul.f32 %v2126_v43, %v688_v22  ;;  %v673_v31 = vsel %vm672_vm7, %v2122_v4, %v669_v34  ;;  %vm696_vm9 = vweird.f32 %v2126_v43 }
 0x2fa   :  { %2127 = vrcp.f32 %v689_v46  ;;  %v637_v44 = vpop.f32.mrf.mxu2  ;;  %v678_v52 = vsel %vm675_vm8, %v677_v28, %v673_v31  ;;  %vm697_vm11 = vmor %vm695_vm10, %vm696_vm9  ;;  %v714_v15 = vand.u32 2147483647, %v689_v46  ;;  %v716_v2 = vand.u32 2147483648, %v689_v46 }
 0x2fb   :  { %v692_v50 = vsub.f32 1.0, %v691_v42  ;;  %v638_v16 = vadd.f32 %v637_v44, %v2409_v40  ;;  %2129 = vtanh.f32 %v722_v35  ;;  %vm710_vm14 = vweird.f32 %v689_v46 }
 0x2fc   :  { %v1247_v29 = vpop.f32.mrf.mxu1  ;;  %v717_v17 = vor.u32 1.1754944e-38, %v716_v2  ;;  %vm715_vm2 = vcmp.eq.f32.partialorder %v714_v15, 8.507059e+37 }
 0x2fd   :  { %v721_v51 = vmul.f32 %v678_v52, %v638_v16  ;;  %v693_v48 = vmul.f32 %v2126_v43, %v692_v50  ;;  %v1248_v0 = vadd.f32 %v1247_v29, %v2515_v25 }
 0x2ff   :  { %v723_v54 = vadd.f32 %v721_v51, %v220_v10  ;;  %v694_v61 = vadd.f32 %v2126_v43, %v693_v48 }
 0x300   :  { %v2128_v55 = vpop.eup %2127 }
 0x301   :  { %v706_v56 = vmul.f32 %v2128_v55, %v689_v46  ;;  %v698_v59 = vsel %vm697_vm11, %v2126_v43, %v694_v61  ;;  %v2130_v4 = vpop.eup %2129  ;;  %vm711_vm13 = vweird.f32 %v2128_v55  ;;  %2131 = vtanh.f32 %v723_v54 }
 0x302   :  { %v1019_v40 = vpop.f32.mrf.mxu2  ;;  %v703_v24 = vsel %vm700_vm12, %v702_v58, %v698_v59  ;;  %vm712_vm15 = vmor %vm710_vm14, %vm711_vm13 }
 0x303   :  { %v707_v37 = vsub.f32 1.0, %v706_v56  ;;  %v1020_v27 = vadd.f32 %v1019_v40, %v2512_v5  ;;  %v726_v1 = vsub.f32 1.0, %v703_v24  ;;  %v730_v20 = vmul.f32 %v703_v24, %v2519_v38 }
 0x304   :  { %v1249_v18 = vpop.f32.mrf.mxu1 }
 0x305   :  { %v1262_v22 = vadd.f32 %v1248_v0, %v1020_v27  ;;  %v708_v6 = vmul.f32 %v2128_v55, %v707_v37  ;;  %v728_v23 = vmul.f32 %v2130_v4, %v726_v1  ;;  %v1250_v34 = vadd.f32 %v1249_v18, %v2523_v45 }
 0x307   :  { %v1929_v33 = vmul.f32 -1.442695, %v1262_v22  ;;  %v709_v26 = vadd.f32 %v2128_v55, %v708_v6  ;;  %v2618_v19 = vadd.f32 %v730_v20, %v728_v23  ;;  %v2132_v47 = vpop.eup %2131 }
 0x309   :  { %2133 = vpow2.f32 %v1929_v33  ;;  %v713_v30 = vsel %vm712_vm15, %v2128_v55, %v709_v26 }
 0x30a   :  { %v1021_v32 = vpop.f32.mrf.mxu2  ;;  %v718_v35 = vsel %vm715_vm2, %v717_v17, %v713_v30 }
 0x30b   :  { %v1022_v36 = vadd.f32 %v1021_v32, %v2521_v39  ;;  %v727_v43 = vsub.f32 1.0, %v718_v35  ;;  %v731_v46 = vmul.f32 %v718_v35, %v2528_v57  ;;  %v734_v57 = vld [vmem:[%s2809_s5] sm:$0x1] }
 0x30c   :  { %v1252_v38 = vpop.f32.mrf.mxu1 }
 0x30d   :  { %v1263_v42 = vadd.f32 %v1250_v34, %v1022_v36  ;;  %v729_v31 = vmul.f32 %v2132_v47, %v727_v43  ;;  %v1253_v29 = vadd.f32 %v1252_v38, %v2535_v63 }
 0x30f   :  { %v2134_v44 = vpop.eup %2133  ;;  %v1930_v28 = vmul.f32 -1.442695, %v1263_v42  ;;  %v2623_v50 = vadd.f32 %v731_v46, %v729_v31 }
 0x310   :  { %v1270_v16 = vadd.f32 1.0, %v2134_v44 }
 0x311   :  { %2135 = vpow2.f32 %v1930_v28  ;;  %v751_v10 = vpack.c.bf16 %v2623_v50, %v2618_v19 }
 0x312   :  { %2137 = vrcp.f32 %v1270_v16  ;;  %v1024_v52 = vpop.f32.mrf.mxu2  ;;  %v1283_v23 = vand.u32 2147483648, %v1270_v16  ;;  %vm1277_vm5 = vweird.f32 %v1270_v16  ;;  %v1281_v33 = vand.u32 2147483647, %v1270_v16 }
 0x313   :  { %v1025_v53 = vadd.f32 %v1024_v52, %v2532_v62  ;;  %762 = vmatpush.bf16.msrb.mxu3 %v751_v10 }
 0x314   :  { %v1254_v48 = vpop.f32.mrf.mxu1  ;;  %v1284_v36 = vor.u32 1.1754944e-38, %v1283_v23  ;;  %vm1282_vm9 = vcmp.eq.f32.partialorder %v1281_v33, 8.507059e+37 }
 0x315   :  { %v1302_v51 = vadd.f32 %v1253_v29, %v1025_v53  ;;  %v1255_v59 = vadd.f32 %v1254_v48, %v2543_v14 }
 0x316   :  { %1827 = vmatmul.msk.bf16.vlgmr.msrb.gmra.mxu3 %vm368_vm4, %v734_v57 }
 0x317   :  { %v2136_v49 = vpop.eup %2135  ;;  %v1931_v54 = vmul.f32 -1.442695, %v1302_v51 }
 0x318   :  { %v2138_v61 = vpop.eup %2137  ;;  %v1271_v55 = vadd.f32 1.0, %v2136_v49 }
 0x319   :  { %2139 = vpow2.f32 %v1931_v54  ;;  %v1273_v58 = vmul.f32 %v2138_v61, %v1270_v16  ;;  %vm1278_vm3 = vweird.f32 %v2138_v61 }
 0x31a   :  { %2141 = vrcp.f32 %v1271_v55  ;;  %v1026_v56 = vpop.f32.mrf.mxu2  ;;  %vm2635_vm6 = vmor %vm1277_vm5, %vm1278_vm3  ;;  %v1298_v30 = vand.u32 2147483648, %v1271_v55  ;;  %v1296_v35 = vand.u32 2147483647, %v1271_v55  ;;  %vm1292_vm8 = vweird.f32 %v1271_v55 }
 0x31b   :  { %v1027_v40 = vadd.f32 %v1026_v56, %v2540_v8  ;;  %v1274_v24 = vsub.f32 1.0, %v1273_v58 }
 0x31c   :  { %v1257_v4 = vpop.f32.mrf.mxu1  ;;  %v1299_v28 = vor.u32 1.1754944e-38, %v1298_v30  ;;  %vm1297_vm11 = vcmp.eq.f32.partialorder %v1296_v35, 8.507059e+37 }
 0x31d   :  { %v1303_v37 = vadd.f32 %v1255_v59, %v1027_v40  ;;  %v1275_v0 = vmul.f32 %v2138_v61, %v1274_v24  ;;  %v1258_v16 = vadd.f32 %v1257_v4, %v2558_v3 }
 0x31f   :  { %v2140_v27 = vpop.eup %2139  ;;  %v1932_v1 = vmul.f32 -1.442695, %v1303_v37  ;;  %v1276_v22 = vadd.f32 %v2138_v61, %v1275_v0 }
 0x320   :  { %v2142_v18 = vpop.eup %2141  ;;  %v1310_v15 = vadd.f32 1.0, %v2140_v27 }
 0x321   :  { %2143 = vpow2.f32 %v1932_v1  ;;  %v1288_v2 = vmul.f32 %v2142_v18, %v1271_v55  ;;  %vm1293_vm7 = vweird.f32 %v2142_v18  ;;  %v1280_v32 = vsel %vm2635_vm6, %v2138_v61, %v1276_v22 }
 0x322   :  { %2145 = vrcp.f32 %v1310_v15  ;;  %v1029_v6 = vpop.f32.mrf.mxu2  ;;  %vm1294_vm10 = vmor %vm1292_vm8, %vm1293_vm7  ;;  %v1285_v31 = vsel %vm1282_vm9, %v1284_v36, %v1280_v32  ;;  %v1323_v49 = vand.u32 2147483648, %v1310_v15  ;;  %vm1317_vm13 = vweird.f32 %v1310_v15 }
 0x323   :  { %v1289_v20 = vsub.f32 1.0, %v1288_v2  ;;  %v1342_v53 = vmul.f32 %v1285_v31, %v1258_v16  ;;  %v1030_v57 = vadd.f32 %v1029_v6, %v2547_v41  ;;  %v1321_v58 = vand.u32 2147483647, %v1310_v15  ;;  %v2006_v31 = vld [vmem:[%s2810_s6 + $0x18] sm:$0xff] }
 0x324   :  { %v1259_v46 = vpop.f32.mrf.mxu1  ;;  %v1324_v37 = vor.u32 1.1754944e-38, %v1323_v49  ;;  %v1873_v16 = vld [vmem:[%s2804_s0 + $0x18] sm:$0xff]  ;;  %s2233_s0 = smov 8  }
 0x325   :  { %v1290_v17 = vmul.f32 %v2142_v18, %v1289_v20  ;;  %v1260_v51 = vadd.f32 %v1259_v46, %v2562_v7  ;;  %v1344_v59 = vadd.f32 %v1342_v53, %v1030_v57  ;;  %vm1322_vm15 = vcmp.eq.f32.partialorder %v1321_v58, 8.507059e+37  ;;  %v2005_v46 = vld [vmem:[%s2810_s6 + $0x10] sm:$0xff] }
 0x327   :  { %v2144_v34 = vpop.eup %2143  ;;  %v1291_v43 = vadd.f32 %v2142_v18, %v1290_v17 }
 0x328   :  { %v2146_v47 = vpop.eup %2145  ;;  %v1311_v38 = vadd.f32 1.0, %v2144_v34 }
 0x329   :  { %v1313_v42 = vmul.f32 %v2146_v47, %v1310_v15  ;;  %v1295_v44 = vsel %vm1294_vm10, %v2142_v18, %v1291_v43  ;;  %vm1318_vm12 = vweird.f32 %v2146_v47 }
 0x32a   :  { %2147 = vrcp.f32 %v1311_v38  ;;  %v1300_v52 = vsel %vm1297_vm11, %v1299_v28, %v1295_v44  ;;  %v1031_v29 = vpop.f32.mrf.mxu2  ;;  %vm1319_vm14 = vmor %vm1317_vm13, %vm1318_vm12  ;;  %v1338_v1 = vand.u32 2147483648, %v1311_v38  ;;  %v1336_v2 = vand.u32 2147483647, %v1311_v38  ;;  %v2004_v44 = vld [vmem:[%s2810_s6 + $0x8] sm:$0xff]  ;;  %v2003_v28 = vld [vmem:[%s2810_s6] sm:$0xff] }
 0x32b   :  { %v1314_v10 = vsub.f32 1.0, %v1313_v42  ;;  %v1343_v54 = vmul.f32 %v1300_v52, %v1260_v51  ;;  %v1032_v61 = vadd.f32 %v1031_v29, %v2564_v13  ;;  %2149 = vtanh.f32 %v1344_v59  ;;  %v2007_v42 = vld [vmem:[%s2810_s6 + $0x20] sm:$0xff] }
 0x32c   :  { %vm1332_vm3 = vweird.f32 %v1311_v38  ;;  %v1339_v15 = vor.u32 1.1754944e-38, %v1338_v1  ;;  %vm1337_vm6 = vcmp.eq.f32.partialorder %v1336_v2, 8.507059e+37  ;;  %v960_v59 = vunpack.c.h.b16 %v1873_v16 }
 0x32d   :  { %v1315_v48 = vmul.f32 %v2146_v47, %v1314_v10  ;;  %v1345_v0 = vadd.f32 %v1343_v54, %v1032_v61  ;;  %v959_v10 = vunpack.c.l.b16 %v1873_v16 }
 0x32f   :  { %v1316_v55 = vadd.f32 %v2146_v47, %v1315_v48  ;;  %2151 = vtanh.f32 %v1345_v0  ;;  %v963_v52 = vpack.c.b16 %v959_v10, %v959_v10 }
 0x330   :  { %v2148_v56 = vpop.eup %2147 }
 0x331   :  { %v1328_v40 = vmul.f32 %v2148_v56, %v1311_v38  ;;  %v1320_v24 = vsel %vm1319_vm14, %v2146_v47, %v1316_v55  ;;  %vm1333_vm2 = vweird.f32 %v2148_v56  ;;  %v2150_v20 = vpop.eup %2149  ;;  %v2010_v38 = vld [vmem:[%s2810_s6 + $0x38] sm:$0xff]  ;;  %v981_v29 = vsel %vm113_vm0, %v963_v52, 0 }
 0x332   :  { %v1325_v4 = vsel %vm1322_vm15, %v1324_v37, %v1320_v24  ;;  %vm1334_vm5 = vmor %vm1332_vm3, %vm1333_vm2  ;;  %822 = vmatpush.bf16.msra.mxu3 %v2010_v38  ;;  %849 = vmatpush.bf16.msrb.mxu0 %v2010_v38  ;;  %v964_v24 = vpack.c.b16 %v960_v59, %v960_v59 }
 0x333   :  { %v1329_v27 = vsub.f32 1.0, %v1328_v40  ;;  %v1348_v22 = vsub.f32 1.0, %v1325_v4  ;;  %v1352_v35 = vmul.f32 %v1325_v4, %v2570_v9  ;;  %v2009_v9 = vld [vmem:[%s2810_s6 + $0x30] sm:$0xff] }
 0x334   :  { %v984_v37 = vsel %vm113_vm0, %v964_v24, 0 }
 0x335   :  { %v1330_v18 = vmul.f32 %v2148_v56, %v1329_v27  ;;  %v1350_v26 = vmul.f32 %v2150_v20, %v1348_v22  ;;  %v2152_v30 = vpop.eup %2151  ;;  %v2202_v22 = vld [vmem:[%s2805_s1 + $0x20] sm:$0xff] }
 0x336   :  { %823 = vmatpush.bf16.msra.mxu3 %v2009_v9  ;;  %850 = vmatpush.bf16.msrb.mxu0 %v2009_v9 }
 0x337   :  { %v1331_v6 = vadd.f32 %v2148_v56, %v1330_v18  ;;  %v2647_v36 = vadd.f32 %v1352_v35, %v1350_v26  ;;  %v2201_v18 = vld [vmem:[%s2805_s1 + $0x18] sm:$0xff] }
 0x339   :  { %v1335_v23 = vsel %vm1334_vm5, %v2148_v56, %v1331_v6 }
 0x33a   :  { %v1340_v33 = vsel %vm1337_vm6, %v1339_v15, %v1335_v23 }
 0x33b   :  { %v1349_v17 = vsub.f32 1.0, %v1340_v33  ;;  %v1353_v34 = vmul.f32 %v1340_v33, %v2572_v21  ;;  %v2008_v21 = vld [vmem:[%s2810_s6 + $0x28] sm:$0xff] }
 0x33c   :  { %824 = vmatpush.bf16.msra.mxu3 %v2008_v21  ;;  %851 = vmatpush.bf16.msrb.mxu0 %v2008_v21 }
 0x33d   :  { %v1351_v32 = vmul.f32 %v2152_v30, %v1349_v17 }
 0x33f   :  { %v2649_v43 = vadd.f32 %v1353_v34, %v1351_v32 }
 0x340   :  { %825 = vmatpush.bf16.msra.mxu3 %v2007_v42  ;;  %852 = vmatpush.bf16.msrb.mxu0 %v2007_v42 }
 0x341   :  { %v1356_v47 = vpack.c.bf16 %v2649_v43, %v2647_v36 }
 0x343   :  { %1364 = vmatpush.bf16.msrb.mxu2 %v1356_v47 }
 0x344   :  { %826 = vmatpush.bf16.msra.mxu3 %v2006_v31  ;;  %853 = vmatpush.bf16.msrb.mxu0 %v2006_v31 }
 0x346   :  { %1933 = vmatmul.msk.bf16.vlgmr.msrb.gmra.mxu2 %vm368_vm4, %v2579_v60 }
 0x348   :  { %827 = vmatpush.bf16.msra.mxu3 %v2005_v46  ;;  %854 = vmatpush.bf16.msrb.mxu0 %v2005_v46 }
 0x34c   :  { %828 = vmatpush.bf16.msra.mxu3 %v2004_v44  ;;  %855 = vmatpush.bf16.msrb.mxu0 %v2004_v44 }
 0x350   :  { %829 = vmatpush.bf16.msra.mxu3 %v2003_v28  ;;  %856 = vmatpush.bf16.msrb.mxu0 %v2003_v28 }
 0x354   :  { %1041 = vmatpush.bf16.msrb.mxu3 %v981_v29  ;;  %1065 = vmatpush.bf16.msra.mxu0 %v984_v37 }
 0x356   :  { %1934 = vmatmul.msk.bf16.gmra.mxu2 %vm368_vm4, %v2588_v11 }
 0x366   :  { %1935 = vmatmul.msk.bf16.gmra.mxu2 %vm368_vm4, %v2597_v12 }
 0x399   :  { %v764_v53 = vpop.f32.mrf.mxu3 }
 0x39a   :  { %vm768_vm7 = vcmp.gt.f32.partialorder %v764_v53, 0.0  ;;  %v769_v57 = vmul.f32 0.2, %v764_v53 }
 0x39c   :  { %v770_v51 = vsel %vm768_vm7, %v764_v53, %v769_v57 }
 0x39d   :  { %v771_v48 = vmul.f32 1.442695, %v770_v51 }
 0x39f   :  { %2153 = vpow2.f32 %v771_v48 }
 0x3a1   :  { %v766_v49 = vpop.f32.mrf.mxu3 }
 0x3a5   :  { %v2154_v54 = vpop.eup %2153 }
 0x3a6   :  { %v773_v61 = vpack.c.bf16 %v2154_v54, %v2154_v54  ;;  %v839_v55 = vperm.slane %v2154_v54, 0  ;;  %v838_v0 = vrot.slane %v2154_v54, 1 }
 0x3a8   :  { %830 = vmatmul.bf16.vlgmr.msra.gmra.mxu3 %v773_v61  ;;  %v843_v58 = vmul.f32 %v839_v55, %v2618_v19  ;;  %v844_v56 = vmul.f32 %v839_v55, %v2623_v50  ;;  %v840_v27 = vperm.slane %v838_v0, 0 }
 0x3aa   :  { %v847_v40 = vpack.c.bf16 %v844_v56, %v843_v58  ;;  %v845_v1 = vmul.f32 %v840_v27, %v2618_v19  ;;  %v846_v4 = vmul.f32 %v840_v27, %v2623_v50  ;;  %v2203_v19 = vld [vmem:[%s2805_s1 + $0x28] sm:$0xff] }
 0x3ac   :  { %857 = vmatmul.bf16.vlgmr.msrb.gmra.mxu0 %v847_v40  ;;  %v848_v2 = vpack.c.bf16 %v846_v4, %v845_v1 }
 0x3b8   :  { %1898 = vmatmul.msk.bf16.vlgmr.msrb.gmra.mxu3 %vm103_vm1, %v2201_v18 }
 0x3bc   :  { %862 = vmatmul.bf16.gmra.mxu0 %v848_v2 }
 0x3c8   :  { %1899 = vmatmul.msk.bf16.gmra.mxu3 %vm103_vm1, %v2202_v22 }
 0x3c9   :  { %v1366_v23 = vpop.f32.mrf.mxu2 }
 0x3ca   :  { %v1367_v46 = vadd.f32 %v1366_v23, %v2515_v25 }
 0x3cc   :  { %1901 = vmatmul.msk.bf16.vlgmr.msra.gmra.mxu0 %vm103_vm1, %v2201_v18 }
 0x3d1   :  { %v1368_v21 = vpop.f32.mrf.mxu2 }
 0x3d2   :  { %v1369_v57 = vadd.f32 %v1368_v21, %v2523_v45 }
 0x3d8   :  { %1900 = vmatmul.msk.bf16.gmra.mxu3 %vm103_vm1, %v2203_v19 }
 0x3d9   :  { %v1371_v51 = vpop.f32.mrf.mxu2 }
 0x3da   :  { %v1372_v59 = vadd.f32 %v1371_v51, %v2535_v63 }
 0x3dc   :  { %1902 = vmatmul.msk.bf16.gmra.mxu0 %vm103_vm1, %v2202_v22 }
 0x3e1   :  { %v1373_v24 = vpop.f32.mrf.mxu2 }
 0x3e2   :  { %v1374_v22 = vadd.f32 %v1373_v24, %v2543_v14 }
 0x3ec   :  { %1903 = vmatmul.msk.bf16.gmra.mxu0 %vm103_vm1, %v2203_v19 }
 0x429   :  { %v858_v50 = vpop.f32.mrf.mxu0 }
 0x42b   :  { %v831_v6 = vpop.f32.mrf.mxu3 }
 0x42c   :  { %v835_v15 = vmax.f32 %v831_v6, 1e-30 }
 0x42e   :  { %2155 = vrcp.f32 %v835_v15 }
 0x431   :  { %v860_v20 = vpop.f32.mrf.mxu0 }
 0x433   :  { %v833_v33 = vpop.f32.mrf.mxu3 }
 0x434   :  { %v2156_v26 = vpop.eup %2155 }
 0x435   :  { %v870_v17 = vperm.slane %v2156_v26, 0  ;;  %v869_v30 = vrot.slane %v2156_v26, 1 }
 0x437   :  { %v874_v32 = vmul.f32 %v870_v17, %v858_v50  ;;  %v875_v35 = vmul.f32 %v870_v17, %v860_v20  ;;  %v871_v34 = vperm.slane %v869_v30, 0  ;;  %v1376_v20 = vpop.f32.mrf.mxu2 }
 0x439   :  { %v878_v47 = vmax.f32 %v874_v32, 0.0  ;;  %v879_v38 = vmax.f32 %v875_v35, 0.0  ;;  %v863_v9 = vpop.f32.mrf.mxu0 }
 0x43a   :  { %v876_v42 = vmul.f32 %v871_v34, %v863_v9 }
 0x43b   :  { %882 = vst [vmem:[#allocation2] sm:$0xff] %v878_v47  ;;  %v1043_v31 = vpop.f32.mrf.mxu3 }
 0x43c   :  { %883 = vst [vmem:[#allocation2 + $0x8] sm:$0xff] %v879_v38  ;;  %v880_v44 = vmax.f32 %v876_v42, 0.0  ;;  %v1044_v28 = vadd.f32 %v1043_v31, %v2512_v5 }
 0x43e   :  { %884 = vst [vmem:[#allocation2 + $0x10] sm:$0xff] %v880_v44  ;;  %v1381_v16 = vadd.f32 %v1367_v46, %v1044_v28 }
 0x440   :  { %v1936_v10 = vmul.f32 -1.442695, %v1381_v16 }
 0x441   :  { %v865_v52 = vpop.f32.mrf.mxu0 }
 0x442   :  { %2157 = vpow2.f32 %v1936_v10  ;;  %v877_v29 = vmul.f32 %v871_v34, %v865_v52 }
 0x443   :  { %v1045_v53 = vpop.f32.mrf.mxu3 }
 0x444   :  { %v881_v48 = vmax.f32 %v877_v29, 0.0  ;;  %v1046_v49 = vadd.f32 %v1045_v53, %v2521_v39  ;;  %v1378_v29 = vpop.f32.mrf.mxu2 }
 0x446   :  { %885 = vst [vmem:[#allocation2 + $0x18] sm:$0xff] %v881_v48  ;;  %v1382_v54 = vadd.f32 %v1369_v57, %v1046_v49  ;;  %v1377_v49 = vadd.f32 %v1376_v20, %v2558_v3 }
 0x448   :  { %v2158_v61 = vpop.eup %2157  ;;  %v1937_v55 = vmul.f32 -1.442695, %v1382_v54 }
 0x449   :  { %v1389_v58 = vadd.f32 1.0, %v2158_v61 }
 0x44a   :  { %2159 = vpow2.f32 %v1937_v55 }
 0x44b   :  { %2161 = vrcp.f32 %v1389_v58  ;;  %v1048_v56 = vpop.f32.mrf.mxu3  ;;  %v1402_v34 = vand.u32 2147483648, %v1389_v58  ;;  %vm1396_vm1 = vweird.f32 %v1389_v58  ;;  %v1400_v38 = vand.u32 2147483647, %v1389_v58 }
 0x44c   :  { %v1049_v40 = vadd.f32 %v1048_v56, %v2532_v62 }
 0x44d   :  { %v1403_v28 = vor.u32 1.1754944e-38, %v1402_v34  ;;  %vm1401_vm11 = vcmp.eq.f32.partialorder %v1400_v38, 8.507059e+37 }
 0x44e   :  { %v1421_v37 = vadd.f32 %v1372_v59, %v1049_v40 }
 0x450   :  { %v2160_v0 = vpop.eup %2159  ;;  %v1938_v27 = vmul.f32 -1.442695, %v1421_v37 }
 0x451   :  { %v2162_v1 = vpop.eup %2161  ;;  %v1390_v4 = vadd.f32 1.0, %v2160_v0 }
 0x452   :  { %2163 = vpow2.f32 %v1938_v27  ;;  %v1392_v18 = vmul.f32 %v2162_v1, %v1389_v58  ;;  %vm1397_vm0 = vweird.f32 %v2162_v1  ;;  %v1379_v58 = vadd.f32 %v1378_v29, %v2562_v7 }
 0x453   :  { %2165 = vrcp.f32 %v1390_v4  ;;  %v1050_v2 = vpop.f32.mrf.mxu3  ;;  %vm2715_vm8 = vmor %vm1396_vm1, %vm1397_vm0  ;;  %v1417_v42 = vand.u32 2147483648, %v1390_v4  ;;  %v1415_v46 = vand.u32 2147483647, %v1390_v4  ;;  %vm1411_vm10 = vweird.f32 %v1390_v4 }
 0x454   :  { %v1051_v19 = vadd.f32 %v1050_v2, %v2540_v8  ;;  %v1393_v50 = vsub.f32 1.0, %v1392_v18 }
 0x455   :  { %v1418_v48 = vor.u32 1.1754944e-38, %v1417_v42  ;;  %vm1416_vm13 = vcmp.eq.f32.partialorder %v1415_v46, 8.507059e+37 }
 0x456   :  { %v1422_v6 = vadd.f32 %v1374_v22, %v1051_v19  ;;  %v1394_v15 = vmul.f32 %v2162_v1, %v1393_v50 }
 0x458   :  { %v2164_v23 = vpop.eup %2163  ;;  %v1939_v33 = vmul.f32 -1.442695, %v1422_v6  ;;  %v1395_v35 = vadd.f32 %v2162_v1, %v1394_v15 }
 0x459   :  { %v2166_v26 = vpop.eup %2165  ;;  %v1429_v17 = vadd.f32 1.0, %v2164_v23 }
 0x45a   :  { %2167 = vpow2.f32 %v1939_v33  ;;  %v1407_v30 = vmul.f32 %v2166_v26, %v1390_v4  ;;  %vm1412_vm9 = vweird.f32 %v2166_v26  ;;  %v1399_v31 = vsel %vm2715_vm8, %v2162_v1, %v1395_v35 }
 0x45b   :  { %2169 = vrcp.f32 %v1429_v17  ;;  %v1053_v32 = vpop.f32.mrf.mxu3  ;;  %vm1413_vm12 = vmor %vm1411_vm10, %vm1412_vm9  ;;  %v1404_v57 = vsel %vm1401_vm11, %v1403_v28, %v1399_v31  ;;  %v1442_v24 = vand.u32 2147483648, %v1429_v17  ;;  %vm1436_vm15 = vweird.f32 %v1429_v17 }
 0x45c   :  { %v1408_v47 = vsub.f32 1.0, %v1407_v30  ;;  %v1054_v56 = vadd.f32 %v1053_v32, %v2547_v41  ;;  %v1461_v59 = vmul.f32 %v1404_v57, %v1377_v49  ;;  %v1440_v1 = vand.u32 2147483647, %v1429_v17 }
 0x45d   :  { %v1443_v19 = vor.u32 1.1754944e-38, %v1442_v24 }
 0x45e   :  { %v1409_v21 = vmul.f32 %v2166_v26, %v1408_v47  ;;  %v1463_v18 = vadd.f32 %v1461_v59, %v1054_v56  ;;  %vm1441_vm3 = vcmp.eq.f32.partialorder %v1440_v1, 8.507059e+37 }
 0x460   :  { %v2168_v44 = vpop.eup %2167  ;;  %v1410_v16 = vadd.f32 %v2166_v26, %v1409_v21 }
 0x461   :  { %v2170_v10 = vpop.eup %2169  ;;  %v1430_v52 = vadd.f32 1.0, %v2168_v44 }
 0x462   :  { %v1432_v53 = vmul.f32 %v2170_v10, %v1429_v17  ;;  %v1414_v51 = vsel %vm1413_vm12, %v2166_v26, %v1410_v16  ;;  %vm1437_vm14 = vweird.f32 %v2170_v10 }
 0x463   :  { %2171 = vrcp.f32 %v1430_v52  ;;  %v1055_v61 = vpop.f32.mrf.mxu3  ;;  %v1419_v55 = vsel %vm1416_vm13, %v1418_v48, %v1414_v51  ;;  %vm1438_vm2 = vmor %vm1436_vm15, %vm1437_vm14  ;;  %v1457_v15 = vand.u32 2147483648, %v1430_v52  ;;  %v1455_v33 = vand.u32 2147483647, %v1430_v52 }
 0x464   :  { %v1433_v54 = vsub.f32 1.0, %v1432_v53  ;;  %v1056_v37 = vadd.f32 %v1055_v61, %v2564_v13  ;;  %v1462_v0 = vmul.f32 %v1419_v55, %v1379_v58  ;;  %2173 = vtanh.f32 %v1463_v18 }
 0x465   :  { %vm1451_vm6 = vweird.f32 %v1430_v52  ;;  %v1458_v17 = vor.u32 1.1754944e-38, %v1457_v15  ;;  %vm1456_vm0 = vcmp.eq.f32.partialorder %v1455_v33, 8.507059e+37 }
 0x466   :  { %v1434_v40 = vmul.f32 %v2170_v10, %v1433_v54  ;;  %v1464_v50 = vadd.f32 %v1462_v0, %v1056_v37 }
 0x468   :  { %v1435_v27 = vadd.f32 %v2170_v10, %v1434_v40  ;;  %2175 = vtanh.f32 %v1464_v50 }
 0x469   :  { %v2172_v4 = vpop.eup %2171 }
 0x46a   :  { %v1447_v2 = vmul.f32 %v2172_v4, %v1430_v52  ;;  %v1439_v22 = vsel %vm1438_vm2, %v2170_v10, %v1435_v27  ;;  %vm1452_vm5 = vweird.f32 %v2172_v4  ;;  %v2174_v35 = vpop.eup %2173 }
 0x46b   :  { %v1444_v23 = vsel %vm1441_vm3, %v1443_v19, %v1439_v22  ;;  %vm1453_vm7 = vmor %vm1451_vm6, %vm1452_vm5 }
 0x46c   :  { %v1448_v6 = vsub.f32 1.0, %v1447_v2  ;;  %v1467_v26 = vsub.f32 1.0, %v1444_v23  ;;  %v1471_v42 = vmul.f32 %v1444_v23, %v2647_v36  ;;  %v1067_v36 = vpop.f32.mrf.mxu0 }
 0x46e   :  { %v1449_v20 = vmul.f32 %v2172_v4, %v1448_v6  ;;  %v1469_v47 = vmul.f32 %v2174_v35, %v1467_v26  ;;  %v2176_v9 = vpop.eup %2175 }
 0x470   :  { %v1450_v30 = vadd.f32 %v2172_v4, %v1449_v20  ;;  %v2727_v46 = vadd.f32 %v1471_v42, %v1469_v47  ;;  %v2024_v20 = vld [vmem:[%s2810_s6 + $0x78] sm:$0xff] }
 0x471   :  { %1684 = vmatpush.bf16.msra.mxu1 %v2024_v20  ;;  %1711 = vmatpush.bf16.msra.mxu2 %v2024_v20 }
 0x472   :  { %v1454_v32 = vsel %vm1453_vm7, %v2172_v4, %v1450_v30 }
 0x473   :  { %v1459_v34 = vsel %vm1456_vm0, %v1458_v17, %v1454_v32 }
 0x474   :  { %v1468_v38 = vsub.f32 1.0, %v1459_v34  ;;  %v1472_v31 = vmul.f32 %v1459_v34, %v2649_v43  ;;  %v1068_v43 = vadd.f32 %v1067_v36, %v2512_v5  ;;  %v1069_v52 = vpop.f32.mrf.mxu0 }
 0x475   :  { %v1070_v51 = vadd.f32 %v1069_v52, %v2521_v39 }
 0x476   :  { %v1470_v21 = vmul.f32 %v2176_v9, %v1468_v38  ;;  %v2023_v9 = vld [vmem:[%s2810_s6 + $0x70] sm:$0xff] }
 0x477   :  { %1685 = vmatpush.bf16.msra.mxu1 %v2023_v9  ;;  %1712 = vmatpush.bf16.msra.mxu2 %v2023_v9 }
 0x478   :  { %v2729_v44 = vadd.f32 %v1472_v31, %v1470_v21 }
 0x47a   :  { %v1475_v28 = vpack.c.bf16 %v2729_v44, %v2727_v46 }
 0x47c   :  { %1483 = vmatpush.bf16.msra.mxu3 %v1475_v28 }
 0x47f   :  { %1940 = vmatmul.msk.bf16.vlgmr.msra.gmra.mxu3 %vm368_vm4, %v2579_v60 }
 0x48f   :  { %1941 = vmatmul.msk.bf16.gmra.mxu3 %vm368_vm4, %v2588_v11  ;;  %v1072_v11 = vpop.f32.mrf.mxu0 }
 0x490   :  { %v1073_v5 = vadd.f32 %v1072_v11, %v2532_v62 }
 0x497   :  { %v1074_v40 = vpop.f32.mrf.mxu0 }
 0x498   :  { %v1075_v37 = vadd.f32 %v1074_v40, %v2540_v8 }
 0x49f   :  { %1942 = vmatmul.msk.bf16.gmra.mxu3 %vm368_vm4, %v2597_v12  ;;  %v1077_v50 = vpop.f32.mrf.mxu0 }
 0x502   :  { %v1485_v16 = vpop.f32.mrf.mxu3 }
 0x503   :  { %v1486_v10 = vadd.f32 %v1485_v16, %v2515_v25 }
 0x505   :  { %v1500_v29 = vadd.f32 %v1486_v10, %v1068_v43 }
 0x507   :  { %v1943_v53 = vmul.f32 -1.442695, %v1500_v29  ;;  %v2022_v29 = vld [vmem:[%s2810_s6 + $0x68] sm:$0xff] }
 0x508   :  { %1686 = vmatpush.bf16.msra.mxu1 %v2022_v29  ;;  %1713 = vmatpush.bf16.msra.mxu2 %v2022_v29 }
 0x509   :  { %2177 = vpow2.f32 %v1943_v53  ;;  %v1079_v53 = vpop.f32.mrf.mxu0 }
 0x50a   :  { %v1487_v57 = vpop.f32.mrf.mxu3 }
 0x50b   :  { %v1488_v60 = vadd.f32 %v1487_v57, %v2523_v45 }
 0x50d   :  { %v1501_v48 = vadd.f32 %v1488_v60, %v1070_v51  ;;  %v1078_v60 = vadd.f32 %v1077_v50, %v2547_v41 }
 0x50f   :  { %v2178_v49 = vpop.eup %2177  ;;  %v1944_v54 = vmul.f32 -1.442695, %v1501_v48 }
 0x510   :  { %v1508_v12 = vadd.f32 1.0, %v2178_v49 }
 0x511   :  { %2179 = vpow2.f32 %v1944_v54 }
 0x512   :  { %2181 = vrcp.f32 %v1508_v12  ;;  %v1490_v61 = vpop.f32.mrf.mxu3  ;;  %v1521_v8 = vand.u32 2147483648, %v1508_v12  ;;  %vm1515_vm8 = vweird.f32 %v1508_v12 }
 0x513   :  { %v1491_v25 = vadd.f32 %v1490_v61, %v2535_v63 }
 0x514   :  { %v1522_v42 = vor.u32 1.1754944e-38, %v1521_v8  ;;  %v2020_v8 = vld [vmem:[%s2810_s6 + $0x58] sm:$0xff] }
 0x515   :  { %v1540_v55 = vadd.f32 %v1491_v25, %v1073_v5  ;;  %v2021_v5 = vld [vmem:[%s2810_s6 + $0x60] sm:$0xff] }
 0x516   :  { %1687 = vmatpush.bf16.msra.mxu1 %v2021_v5  ;;  %1714 = vmatpush.bf16.msra.mxu2 %v2021_v5 }
 0x517   :  { %v2180_v58 = vpop.eup %2179  ;;  %v1945_v56 = vmul.f32 -1.442695, %v1540_v55 }
 0x518   :  { %v2182_v59 = vpop.eup %2181  ;;  %v1509_v39 = vadd.f32 1.0, %v2180_v58 }
 0x519   :  { %2183 = vpow2.f32 %v1945_v56  ;;  %v1511_v45 = vmul.f32 %v2182_v59, %v1508_v12  ;;  %vm1516_vm1 = vweird.f32 %v2182_v59 }
 0x51a   :  { %2185 = vrcp.f32 %v1509_v39  ;;  %v1492_v24 = vpop.f32.mrf.mxu3  ;;  %vm2753_vm10 = vmor %vm1515_vm8, %vm1516_vm1  ;;  %vm1530_vm11 = vweird.f32 %v1509_v39  ;;  %v1536_v17 = vand.u32 2147483648, %v1509_v39  ;;  %v1534_v38 = vand.u32 2147483647, %v1509_v39  ;;  %1688 = vmatpush.bf16.msra.mxu1 %v2020_v8  ;;  %1715 = vmatpush.bf16.msra.mxu2 %v2020_v8 }
 0x51b   :  { %v1493_v0 = vadd.f32 %v1492_v24, %v2543_v14  ;;  %v1512_v27 = vsub.f32 1.0, %v1511_v45  ;;  %v1519_v14 = vand.u32 2147483647, %v1508_v12  ;;  %v1080_v12 = vadd.f32 %v1079_v53, %v2564_v13 }
 0x51c   :  { %v1537_v10 = vor.u32 1.1754944e-38, %v1536_v17  ;;  %vm1535_vm14 = vcmp.eq.f32.partialorder %v1534_v38, 8.507059e+37 }
 0x51d   :  { %v1541_v1 = vadd.f32 %v1493_v0, %v1075_v37  ;;  %v1513_v2 = vmul.f32 %v2182_v59, %v1512_v27  ;;  %vm1520_vm13 = vcmp.eq.f32.partialorder %v1519_v14, 8.507059e+37 }
 0x51f   :  { %v2184_v4 = vpop.eup %2183  ;;  %v1946_v62 = vmul.f32 -1.442695, %v1541_v1  ;;  %v1514_v15 = vadd.f32 %v2182_v59, %v1513_v2 }
 0x520   :  { %v2186_v18 = vpop.eup %2185  ;;  %v2747_v63 = vadd.f32 1.0, %v2184_v4 }
 0x521   :  { %2187 = vpow2.f32 %v1946_v62  ;;  %v1526_v22 = vmul.f32 %v2186_v18, %v1509_v39  ;;  %vm1531_vm9 = vweird.f32 %v2186_v18  ;;  %v1518_v47 = vsel %vm2753_vm10, %v2182_v59, %v1514_v15  ;;  %v1947_v15 = vld [vmem:[%s2809_s5 + $0x1] sm:$0x1] }
 0x522   :  { %2189 = vrcp.f32 %v2747_v63  ;;  %v1495_v19 = vpop.f32.mrf.mxu3  ;;  %vm2765_vm12 = vmor %vm1530_vm11, %vm1531_vm9  ;;  %v1523_v16 = vsel %vm1520_vm13, %v1522_v42, %v1518_v47  ;;  %v1561_v48 = vand.u32 2147483648, %v2747_v63  ;;  %vm1555_vm2 = vweird.f32 %v2747_v63 }
 0x523   :  { %v1527_v6 = vsub.f32 1.0, %v1526_v22  ;;  %v1496_v34 = vadd.f32 %v1495_v19, %v2558_v3  ;;  %v1559_v49 = vand.u32 2147483647, %v2747_v63 }
 0x524   :  { %v1562_v55 = vor.u32 1.1754944e-38, %v1561_v48 }
 0x525   :  { %v1528_v23 = vmul.f32 %v2186_v18, %v1527_v6  ;;  %v1580_v52 = vmul.f32 %v1523_v16, %v1496_v34  ;;  %vm1560_vm5 = vcmp.eq.f32.partialorder %v1559_v49, 8.507059e+37 }
 0x527   :  { %v2188_v33 = vpop.eup %2187  ;;  %v1529_v30 = vadd.f32 %v2186_v18, %v1528_v23  ;;  %v1582_v61 = vadd.f32 %v1580_v52, %v1078_v60  ;;  %v2017_v23 = vld [vmem:[%s2810_s6 + $0x40] sm:$0xff] }
 0x528   :  { %v2190_v32 = vpop.eup %2189  ;;  %v1549_v35 = vadd.f32 1.0, %v2188_v33 }
 0x529   :  { %v1551_v21 = vmul.f32 %v2190_v32, %v2747_v63  ;;  %v1533_v28 = vsel %vm2765_vm12, %v2186_v18, %v1529_v30  ;;  %vm1556_vm15 = vweird.f32 %v2190_v32 }
 0x52a   :  { %2191 = vrcp.f32 %v1549_v35  ;;  %v1497_v3 = vpop.f32.mrf.mxu3  ;;  %v1538_v51 = vsel %vm1535_vm14, %v1537_v10, %v1533_v28  ;;  %vm1557_vm3 = vmor %vm1555_vm2, %vm1556_vm15  ;;  %v1576_v59 = vand.u32 2147483648, %v1549_v35  ;;  %v1574_v39 = vand.u32 2147483647, %v1549_v35 }
 0x52b   :  { %v1552_v36 = vsub.f32 1.0, %v1551_v21  ;;  %v1498_v43 = vadd.f32 %v1497_v3, %v2562_v7  ;;  %2193 = vtanh.f32 %v1582_v61  ;;  %vm1570_vm7 = vweird.f32 %v1549_v35 }
 0x52c   :  { %v1577_v37 = vor.u32 1.1754944e-38, %v1576_v59  ;;  %vm1575_vm1 = vcmp.eq.f32.partialorder %v1574_v39, 8.507059e+37 }
 0x52d   :  { %v1553_v57 = vmul.f32 %v2190_v32, %v1552_v36  ;;  %v1581_v11 = vmul.f32 %v1538_v51, %v1498_v43 }
 0x52f   :  { %v1554_v7 = vadd.f32 %v2190_v32, %v1553_v57  ;;  %v1583_v58 = vadd.f32 %v1581_v11, %v1080_v12 }
 0x530   :  { %v2192_v54 = vpop.eup %2191 }
 0x531   :  { %v1566_v41 = vmul.f32 %v2192_v54, %v1549_v35  ;;  %v1558_v25 = vsel %vm1557_vm3, %v2190_v32, %v1554_v7  ;;  %vm1571_vm6 = vweird.f32 %v2192_v54  ;;  %2195 = vtanh.f32 %v1583_v58  ;;  %v2194_v27 = vpop.eup %2193 }
 0x532   :  { %v1563_v40 = vsel %vm1560_vm5, %v1562_v55, %v1558_v25  ;;  %vm1572_vm0 = vmor %vm1570_vm7, %vm1571_vm6 }
 0x533   :  { %v1567_v56 = vsub.f32 1.0, %v1566_v41  ;;  %v1586_v45 = vsub.f32 1.0, %v1563_v40  ;;  %v1590_v2 = vmul.f32 %v1563_v40, %v2727_v46  ;;  %v2019_v46 = vld [vmem:[%s2810_s6 + $0x50] sm:$0xff] }
 0x534   :  { %1689 = vmatpush.bf16.msra.mxu1 %v2019_v46  ;;  %1716 = vmatpush.bf16.msra.mxu2 %v2019_v46 }
 0x535   :  { %v1568_v13 = vmul.f32 %v2192_v54, %v1567_v56  ;;  %v1588_v4 = vmul.f32 %v2194_v27, %v1586_v45 }
 0x537   :  { %v1569_v24 = vadd.f32 %v2192_v54, %v1568_v13  ;;  %v2196_v18 = vpop.eup %2195  ;;  %v1592_v19 = vadd.f32 %v1590_v2, %v1588_v4 }
 0x539   :  { %v1573_v0 = vsel %vm1572_vm0, %v2192_v54, %v1569_v24 }
 0x53a   :  { %v1578_v1 = vsel %vm1575_vm1, %v1577_v37, %v1573_v0 }
 0x53b   :  { %v1587_v62 = vsub.f32 1.0, %v1578_v1  ;;  %v1591_v22 = vmul.f32 %v1578_v1, %v2729_v44  ;;  %v2018_v44 = vld [vmem:[%s2810_s6 + $0x48] sm:$0xff]  ;;  %s2231_s6 = smov [#allocation2]  }
 0x53c   :  { %1690 = vmatpush.bf16.msra.mxu1 %v2018_v44  ;;  %1717 = vmatpush.bf16.msra.mxu2 %v2018_v44  ;;  %s1752_s20 = sshll.u32 %s2231_s6, 4  ;;  %s1753_s20 = int_to_ptr.vmem [resolvable:$true] %s1752_s20 }
 0x53d   :  { %v1589_v63 = vmul.f32 %v2196_v18, %v1587_v62 }
 0x53f   :  { %v1593_v50 = vadd.f32 %v1591_v22, %v1589_v63 }
 0x540   :  { %1691 = vmatpush.bf16.msra.mxu1 %v2017_v23  ;;  %1718 = vmatpush.bf16.msra.mxu2 %v2017_v23 }
 0x541   :  { %v1613_v6 = vpack.c.bf16 %v1593_v50, %v1592_v19 }
 0x543   :  { %1624 = vmatpush.bf16.msrb.mxu0 %v1613_v6 }
 0x546   :  { %1964 = vmatmul.msk.bf16.vlgmr.msrb.gmra.mxu0 %vm368_vm4, %v1947_v15 }
 0x5c3   :  { %v1626_v14 = vpop.f32.mrf.mxu0 }
 0x5c4   :  { %vm1630_vm4 = vcmp.gt.f32.partialorder %v1626_v14, 0.0  ;;  %v1631_v20 = vmul.f32 0.2, %v1626_v14 }
 0x5c6   :  { %v1632_v33 = vsel %vm1630_vm4, %v1626_v14, %v1631_v20 }
 0x5c7   :  { %v1633_v26 = vmul.f32 1.442695, %v1632_v33 }
 0x5c9   :  { %2197 = vpow2.f32 %v1633_v26 }
 0x5cb   :  { %v1628_v30 = vpop.f32.mrf.mxu0 }
 0x5cf   :  { %v2198_v17 = vpop.eup %2197 }
 0x5d0   :  { %v1635_v32 = vpack.c.bf16 %v2198_v17, %v2198_v17  ;;  %v1701_v35 = vperm.slane %v2198_v17, 0  ;;  %v1700_v9 = vrot.slane %v2198_v17, 1 }
 0x5d2   :  { %1692 = vmatmul.bf16.vlgmr.msra.gmra.mxu1 %v1635_v32  ;;  %v1705_v34 = vmul.f32 %v1701_v35, %v1592_v19  ;;  %v1706_v47 = vmul.f32 %v1701_v35, %v1593_v50  ;;  %v1702_v21 = vperm.slane %v1700_v9, 0 }
 0x5d4   :  { %v1709_v38 = vpack.c.bf16 %v1706_v47, %v1705_v34  ;;  %v1707_v42 = vmul.f32 %v1702_v21, %v1592_v19  ;;  %v1708_v31 = vmul.f32 %v1702_v21, %v1593_v50 }
 0x5d6   :  { %1719 = vmatmul.bf16.vlgmr.msra.gmra.mxu2 %v1709_v38  ;;  %v1710_v3 = vpack.c.bf16 %v1708_v31, %v1707_v42 }
 0x5e6   :  { %1724 = vmatmul.bf16.gmra.mxu2 %v1710_v3 }
 0x64f   :  { %v1693_v28 = vpop.f32.mrf.mxu1 }
 0x650   :  { %v1697_v36 = vmax.f32 %v1693_v28, 1e-30 }
 0x652   :  { %2199 = vrcp.f32 %v1697_v36 }
 0x657   :  { %v1695_v16 = vpop.f32.mrf.mxu1 }
 0x658   :  { %v2200_v43 = vpop.eup %2199 }
 0x659   :  { %v1720_v10 = vpop.f32.mrf.mxu2  ;;  %v1732_v52 = vperm.slane %v2200_v43, 0  ;;  %v1731_v48 = vrot.slane %v2200_v43, 1 }
 0x65b   :  { %v1736_v29 = vmul.f32 %v1732_v52, %v1720_v10  ;;  %v1733_v11 = vperm.slane %v1731_v48, 0 }
 0x65d   :  { %v1740_v53 = vmax.f32 %v1736_v29, 0.0 }
 0x65f   :  { %1744 = vst [vmem:[#allocation2 + $0x20] sm:$0xff] %v1740_v53 }
 0x661   :  { %v1722_v57 = vpop.f32.mrf.mxu2 }
 0x662   :  { %v1737_v51 = vmul.f32 %v1732_v52, %v1722_v57 }
 0x664   :  { %v1741_v60 = vmax.f32 %v1737_v51, 0.0 }
 0x666   :  { %1745 = vst [vmem:[#allocation2 + $0x28] sm:$0xff] %v1741_v60 }
 0x669   :  { %v1725_v7 = vpop.f32.mrf.mxu2 }
 0x66a   :  { %v1738_v49 = vmul.f32 %v1733_v11, %v1725_v7 }
 0x66c   :  { %v1742_v54 = vmax.f32 %v1738_v49, 0.0 }
 0x66e   :  { %1746 = vst [vmem:[#allocation2 + $0x30] sm:$0xff] %v1742_v54 }
 0x671   :  { %v1727_v12 = vpop.f32.mrf.mxu2 }
 0x672   :  { %v1739_v61 = vmul.f32 %v1733_v11, %v1727_v12 }
 0x674   :  { %v1743_v5 = vmax.f32 %v1739_v61, 0.0 }
 0x676   :  { %1747 = vst [vmem:[#allocation2 + $0x38] sm:$0xff] %v1743_v5 }
 0x677   :  { %1760 = dma.vmem_to_hbm [thread:$0]  %s1753_s20, 1024, %s1755_s23, [#allocation3], %s2232_s24, %s2232_s24, %s2233_s0  }
 0x678   :  { %2228 = dma.done.wait [#allocation3], 1024  }
 0x679   :  { %2229 = vsyncadd [#allocation3], 4294966272 }
 0x67a   :  { %1765 = vsyncpa [#allocation3], 1 }

</bundles_post_ra>
